<compile_context>
chip_gen: v7x
topology: tpu7x:2x2x1
jax: 0.10.0
libtpu: 0.0.40
codegen_flags: <defaults>
</compile_context>

<pallas_src>
import functools

import jax
import jax.numpy as jnp
import numpy as np
from jax.experimental import pallas as pl
from jax.experimental.pallas import tpu as pltpu

LEVELS = (1, 2, 4)
N_PAD = 128          # lane padding for the 3-way logits


# ----------------------------------------------------------------------------- kernel
def _hier_kernel(x_ref, w1_ref, b1_ref, w2_ref, b2_ref, w3_ref, b3_ref,
                 wa1_ref, ba1_ref, wa2_ref, ba2_ref, out_ref,
                 *, s4, E, tile_r, cdt, use_roll):
    """One program = tile_r rows of the phase-major [B*s4, 4E] layout
    (tile_r = tb * s4, i.e. whole batch elements, so batch boundaries are static)."""
    xt = x_ref[...]                                       # [tile_r, 4E] f32

    def mlp(x2d, i):
        # Linear(E->D) + ReLU + Dropout(identity in eval) + Linear(D->D) + ReLU + Linear(D->E)
        # TODO(synk): Dropout(0.1) is a no-op here (inference semantics); training parity
        # would need in-kernel PRNG masking.
        h = jnp.dot(x2d.astype(cdt), w1_ref[i], preferred_element_type=jnp.float32) + b1_ref[i]
        h = jnp.maximum(h, 0.0)
        h = jnp.dot(h.astype(cdt), w2_ref[i], preferred_element_type=jnp.float32) + b2_ref[i]
        h = jnp.maximum(h, 0.0)
        return jnp.dot(h.astype(cdt), w3_ref[i], preferred_element_type=jnp.float32) + b3_ref[i]

    # phase p holds original sequence rows t = 4*m + p
    phases = [xt[:, p * E:(p + 1) * E] for p in range(4)]

    # Level-2 / level-4 coarse outputs (shared across phases), batch-folded (M = tile_r).
    z2a = mlp(phases[0], 1)                               # level-2 MLP on rows x[::2], even idx
    z2b = mlp(phases[2], 1)                               # level-2 MLP on rows x[::2], odd  idx
    z4 = mlp(phases[0], 2)                                # level-4 MLP on rows x[::4]

    # Fused level-1 MLP: one chain with M = 4*tile_r (phase-block stacked along sublanes).
    x_stack = jnp.concatenate(phases, axis=0)             # [4*tile_r, E]
    y1_all = mlp(x_stack, 0)                              # [4*tile_r, E] f32

    # Per-batch-element boundary masks (rows are aligned to batch boundaries).
    row = jax.lax.broadcasted_iota(jnp.int32, (tile_r, 1), 0)
    grp = row % s4
    first = grp == 0
    last = grp == (s4 - 1)

    def shift_prev(z, fill):                              # z[m-1], clamped per batch element
        if use_roll:
            zs = pltpu.roll(z, shift=1, axis=0)           # XLU sublane rotate (lane-aligned E)
        else:
            zs = jnp.concatenate([z[:1, :], z[:-1, :]], axis=0)
        return jnp.where(first, fill, zs)

    def shift_next(z, fill):                              # z[m+1], clamped per batch element
        if use_roll:
            zs = pltpu.roll(z, shift=tile_r - 1, axis=0)
        else:
            zs = jnp.concatenate([z[1:, :], z[-1:, :]], axis=0)
        return jnp.where(last, fill, zs)

    z4_prev = shift_prev(z4, z4)                          # used by phases 0, 1
    z4_next = shift_next(z4, z4)                          # used by phases 2, 3

    # Streamed epilogue: produce and store one phase at a time.
    # 2-tap linear-interpolation stencils == F.interpolate(mode='linear',
    # align_corners=False) for exact 2x / 4x upsampling, decomposed by output phase.
    for p in range(4):
        y1p = y1_all[p * tile_r:(p + 1) * tile_r, :]
        if p == 0:
            y2p = 0.25 * shift_prev(z2b, z2a) + 0.75 * z2a
            y4p = 0.375 * z4_prev + 0.625 * z4
        elif p == 1:
            y2p = 0.75 * z2a + 0.25 * z2b
            y4p = 0.125 * z4_prev + 0.875 * z4
        elif p == 2:
            y2p = 0.25 * z2a + 0.75 * z2b
            y4p = 0.875 * z4 + 0.125 * z4_next
        else:
            y2p = 0.75 * z2b + 0.25 * shift_next(z2a, z2b)
            y4p = 0.625 * z4 + 0.375 * z4_next

        # attention over concat([y1,y2,y4], -1): wa1 is pre-split => sum of 3 dots
        h = (jnp.dot(y1p.astype(cdt), wa1_ref[0], preferred_element_type=jnp.float32)
             + jnp.dot(y2p.astype(cdt), wa1_ref[1], preferred_element_type=jnp.float32)
             + jnp.dot(y4p.astype(cdt), wa1_ref[2], preferred_element_type=jnp.float32)
             + ba1_ref[...])
        h = jnp.maximum(h, 0.0)
        logits = jnp.dot(h.astype(cdt), wa2_ref[...],
                         preferred_element_type=jnp.float32) + ba2_ref[...]   # [tile_r, 128]
        # columnized softmax over the 3 levels (lane-dense padded logits, only cols 0..2 used)
        l1, l2, l3 = logits[:, 0:1], logits[:, 1:2], logits[:, 2:3]
        m = jnp.maximum(jnp.maximum(l1, l2), l3)
        e1 = jnp.exp(l1 - m)
        e2 = jnp.exp(l2 - m)
        e3 = jnp.exp(l3 - m)
        inv = pl.reciprocal(e1 + e2 + e3, approx=True)
        out_ref[:, p * E:(p + 1) * E] = ((e1 * y1p + e2 * y2p + e3 * y4p) * inv
                                         ).astype(out_ref.dtype)


# ----------------------------------------------------------------------------- wrapper
def _pick_tile_batches(B, s4, target_rows):
    """Pick tb | B s.t. tile_r = tb*s4 is (8,128)-legal, the grid has >= 2 steps when a
    legal split exists (v7x megacore), tile_r <= target_rows when possible, preferring
    16-row alignment (packed bf16 intermediates)."""
    legal = [d for d in range(1, B + 1)
             if B % d == 0 and ((d * s4) % 8 == 0 or d == B)]
    multi = [d for d in legal if B // d >= 2]
    pool = multi if multi else legal
    under = [d for d in pool if d * s4 <= target_rows]
    if under:
        best = max(under)
        aligned = [d for d in under if (d * s4) % 16 == 0]
        if aligned and max(aligned) * 2 >= best:
            best = max(aligned)
        return best
    return min(pool)
    # TODO(synk): intra-sequence (halo) tiling for very long S with tiny B is not
    # implemented; tiles are always whole batch elements.


def hierarchical_processor(x, params, compute_dtype=jnp.bfloat16, target_rows=256):
    """x: [B, S, E] float32 -> [B, S, E] float32 (adaptive aggregation path)."""
    B, S, E = x.shape
    assert S % 4 == 0 and S >= 4, "stencil upsample path requires seq_len % 4 == 0"
    # TODO(synk): seq_len not a multiple of 4 would need the dense interp-matrix fallback.
    s4 = S // 4

    (w1, b1, w2, b2, w3, b3, wa1, ba1, wa2, ba2) = params
    cdt = compute_dtype
    D = w1.shape[-1]
    n_lvl = wa2.shape[-1]

    w1c, w2c, w3c, wa1c = (a.astype(cdt) for a in (w1, w2, w3, wa1))
    # pad the 3-wide logits head to 128 lanes (lane-dense MXU result; cols 3.. unused)
    wa2c = jnp.zeros((wa2.shape[0], N_PAD), cdt).at[:, :n_lvl].set(wa2.astype(cdt))
    ba2p = jnp.zeros((1, N_PAD), jnp.float32).at[:, :n_lvl].set(ba2)

    tb = _pick_tile_batches(B, s4, target_rows)
    tile_r = tb * s4
    grid = (B // tb,)
    use_roll = (E % 128 == 0) and (tile_r % 8 == 0)   # XLU roll only at lane-aligned E

    # Free (bitcast) reshape to phase-major layout; x stays f32 (bf16 cast happens in-kernel).
    xp = x.reshape(B * s4, 4 * E)

    def full(a):
        nd = a.ndim
        return pl.BlockSpec(a.shape, lambda i, _nd=nd: (0,) * _nd,
                            pipeline_mode=pl.Buffered(1))   # grid-invariant: single buffer

    in_specs = [pl.BlockSpec((tile_r, 4 * E), lambda i: (i, 0)),
                full(w1c), full(b1), full(w2c), full(b2), full(w3c), full(b3),
                full(wa1c), full(ba1), full(wa2c), full(ba2p)]
    out_specs = pl.BlockSpec((tile_r, 4 * E), lambda i: (i, 0))

    kernel = functools.partial(_hier_kernel, s4=s4, E=E, tile_r=tile_r, cdt=cdt,
                               use_roll=use_roll)

    # Advisory cost estimate for XLA scheduling around the kernel.
    rows = B * S
    mlp_rows = rows + rows // 2 + rows // 4
    flops = (2 * mlp_rows * (E * D + D * D + D * E)
             + 2 * rows * (3 * E * D + D * N_PAD))
    weight_bytes = sum(int(np.prod(a.shape)) * a.dtype.itemsize
                       for a in (w1c, b1, w2c, b2, w3c, b3, wa1c, ba1, wa2c, ba2p))
    bytes_accessed = rows * E * 4 * 2 + weight_bytes
    ce = pl.CostEstimate(flops=int(flops), transcendentals=int(4 * rows),
                         bytes_accessed=int(bytes_accessed))

    # Explicit VMEM budget: weights (single-buffered) + double-buffered x/out tiles + working set.
    xtile = tile_r * 4 * E * 4
    working = tile_r * (4 * E + D) * 4 * 12
    est = weight_bytes + 4 * xtile + working
    vmem_limit = int(min(128 * 2 ** 20, max(32 * 2 ** 20, 2 * est)))

    out = pl.pallas_call(
        kernel,
        grid=grid,
        in_specs=in_specs,
        out_specs=out_specs,
        out_shape=jax.ShapeDtypeStruct((B * s4, 4 * E), jnp.float32),
        compiler_params=pltpu.CompilerParams(
            dimension_semantics=("parallel",),
            vmem_limit_bytes=vmem_limit),
        cost_estimate=ce,
    )(xp, w1c, b1, w2c, b2, w3c, b3, wa1c, ba1, wa2c, ba2p)
    return out.reshape(B, S, E)


# ----------------------------------------------------------------------------- params / reference
def init_params(key, E, D, n_levels=3):
    """Deterministic init mimicking nn.Linear default (uniform +/- 1/sqrt(fan_in))."""
    def linear(k, fan_in, fan_out):
        kw, kb = jax.random.split(k)
        bound = 1.0 / np.sqrt(fan_in)
        w = jax.random.uniform(kw, (fan_in, fan_out), jnp.float32, -bound, bound)
        b = jax.random.uniform(kb, (1, fan_out), jnp.float32, -bound, bound)
        return w, b

    keys = jax.random.split(key, n_levels * 3 + 2)
    w1s, b1s, w2s, b2s, w3s, b3s = [], [], [], [], [], []
    ki = 0
    for _ in range(n_levels):
        w, b = linear(keys[ki], E, D); ki += 1; w1s.append(w); b1s.append(b)
        w, b = linear(keys[ki], D, D); ki += 1; w2s.append(w); b2s.append(b)
        w, b = linear(keys[ki], D, E); ki += 1; w3s.append(w); b3s.append(b)
    wa1_full, ba1 = linear(keys[ki], E * n_levels, D); ki += 1
    wa2, ba2 = linear(keys[ki], D, n_levels)

    params = (
        jnp.stack(w1s), jnp.stack(b1s),
        jnp.stack(w2s), jnp.stack(b2s),
        jnp.stack(w3s), jnp.stack(b3s),
        jnp.stack([wa1_full[i * E:(i + 1) * E] for i in range(n_levels)]),  # [3, E, D]
        ba1, wa2, ba2,
    )
    return params, wa1_full


def _linear_interp_matrix(s_out: int, s_in: int) -> np.ndarray:
    """U [s_out, s_in] reproducing F.interpolate(mode='linear', align_corners=False)."""
    if s_in == s_out:
        return np.eye(s_out, dtype=np.float32)
    scale = s_in / s_out
    j = np.arange(s_out)
    src = np.maximum((j + 0.5) * scale - 0.5, 0.0)
    i0 = np.minimum(np.floor(src).astype(np.int64), s_in - 1)
    frac = (src - i0).astype(np.float32)
    i1 = np.minimum(i0 + 1, s_in - 1)
    U = np.zeros((s_out, s_in), dtype=np.float32)
    U[j, i0] += (1.0 - frac)
    U[j, i1] += frac
    return U


def ref_forward(x, params, wa1_full, compute_dtype=jnp.bfloat16):
    """Pure-JAX reference mirroring the PyTorch forward (with matched bf16 dot inputs)."""
    w1, b1, w2, b2, w3, b3, _, ba1, wa2, ba2 = params
    cdt = compute_dtype
    S = x.shape[1]

    def dot(a, w):
        return jnp.dot(a.astype(cdt), w.astype(cdt), preferred_element_type=jnp.float32)

    outs = []
    for i, L in enumerate(LEVELS):
        xd = x[:, ::L, :]
        h = jax.nn.relu(dot(xd, w1[i]) + b1[i][0])
        h = jax.nn.relu(dot(h, w2[i]) + b2[i][0])
        y = dot(h, w3[i]) + b3[i][0]
        if y.shape[1] != S:
            up = jnp.asarray(_linear_interp_matrix(S, y.shape[1]))
            y = jnp.einsum('ts,bse->bte', up, y)
        outs.append(y)
    cat = jnp.concatenate(outs, axis=-1)
    h = jax.nn.relu(dot(cat, wa1_full) + ba1[0])
    attn = jax.nn.softmax(dot(h, wa2) + ba2[0], axis=-1)
    return sum(attn[..., i:i + 1] * outs[i] for i in range(len(outs)))


if __name__ == "__main__":
    B, S, E, D = 2, 8, 4, 32   # batch, seq_len, enc_in, d_model
    key = jax.random.PRNGKey(0)
    kx, kp = jax.random.split(key)
    x = jax.random.normal(kx, (B, S, E), dtype=jnp.float32)
    params, wa1_full = init_params(kp, E, D)

    out = hierarchical_processor(x, params)
    out = jax.block_until_ready(out)

    ref = ref_forward(x, params, wa1_full)
    # tolerance sized for bf16 matmul inputs (f32 accumulation) + approx reciprocal
    np.testing.assert_allclose(np.asarray(out), np.asarray(ref), rtol=5e-3, atol=5e-3)
    print("KERNEL_OK")
</pallas_src>

<mosaic_0001>
module attributes {stable_mosaic.version = 11 : i64} {
  func.func @_hier_kernel(%arg0: i32, %arg1: memref<4x16xf32, #tpu.memory_space<vmem>>, %arg2: memref<3x4x32xbf16, #tpu.memory_space<vmem>>, %arg3: memref<3x1x32xf32, #tpu.memory_space<vmem>>, %arg4: memref<3x32x32xbf16, #tpu.memory_space<vmem>>, %arg5: memref<3x1x32xf32, #tpu.memory_space<vmem>>, %arg6: memref<3x32x4xbf16, #tpu.memory_space<vmem>>, %arg7: memref<3x1x4xf32, #tpu.memory_space<vmem>>, %arg8: memref<3x4x32xbf16, #tpu.memory_space<vmem>>, %arg9: memref<1x32xf32, #tpu.memory_space<vmem>>, %arg10: memref<32x128xbf16, #tpu.memory_space<vmem>>, %arg11: memref<1x128xf32, #tpu.memory_space<vmem>>, %arg12: memref<4x16xf32, #tpu.memory_space<vmem>>) attributes {dimension_semantics = [#tpu.dimension_semantics<parallel>], iteration_bounds = array<i64: 1>, scalar_prefetch = 0 : i64, scratch_operands = 0 : i64, tpu.core_type = #tpu.core_type<tc>, window_params = [{transform_indices = @transform_0, window_bounds = array<i64: 4, 16>}, {pipeline_mode = #tpu.pipeline_mode<synchronous>, transform_indices = @transform_1, window_bounds = array<i64: 3, 4, 32>}, {pipeline_mode = #tpu.pipeline_mode<synchronous>, transform_indices = @transform_2, window_bounds = array<i64: 3, 1, 32>}, {pipeline_mode = #tpu.pipeline_mode<synchronous>, transform_indices = @transform_3, window_bounds = array<i64: 3, 32, 32>}, {pipeline_mode = #tpu.pipeline_mode<synchronous>, transform_indices = @transform_4, window_bounds = array<i64: 3, 1, 32>}, {pipeline_mode = #tpu.pipeline_mode<synchronous>, transform_indices = @transform_5, window_bounds = array<i64: 3, 32, 4>}, {pipeline_mode = #tpu.pipeline_mode<synchronous>, transform_indices = @transform_6, window_bounds = array<i64: 3, 1, 4>}, {pipeline_mode = #tpu.pipeline_mode<synchronous>, transform_indices = @transform_7, window_bounds = array<i64: 3, 4, 32>}, {pipeline_mode = #tpu.pipeline_mode<synchronous>, transform_indices = @transform_8, window_bounds = array<i64: 1, 32>}, {pipeline_mode = #tpu.pipeline_mode<synchronous>, transform_indices = @transform_9, window_bounds = array<i64: 32, 128>}, {pipeline_mode = #tpu.pipeline_mode<synchronous>, transform_indices = @transform_10, window_bounds = array<i64: 1, 128>}, {transform_indices = @transform_11, window_bounds = array<i64: 4, 16>}]} {
    %c0 = arith.constant 0 : index
    %c0_0 = arith.constant 0 : index
    %0 = vector.load %arg1[%c0, %c0_0] : memref<4x16xf32, #tpu.memory_space<vmem>>, vector<4x16xf32>
    %1 = vector.extract_strided_slice %0 {offsets = [0, 0], sizes = [4, 4], strides = [1, 1]} : vector<4x16xf32> to vector<4x4xf32>
    %2 = vector.extract_strided_slice %0 {offsets = [0, 4], sizes = [4, 4], strides = [1, 1]} : vector<4x16xf32> to vector<4x4xf32>
    %3 = vector.extract_strided_slice %0 {offsets = [0, 8], sizes = [4, 4], strides = [1, 1]} : vector<4x16xf32> to vector<4x4xf32>
    %4 = vector.extract_strided_slice %0 {offsets = [0, 12], sizes = [4, 4], strides = [1, 1]} : vector<4x16xf32> to vector<4x4xf32>
    %5 = arith.truncf %1 : vector<4x4xf32> to vector<4x4xbf16>
    %c1 = arith.constant 1 : index
    %c0_1 = arith.constant 0 : index
    %c0_2 = arith.constant 0 : index
    %6 = vector.load %arg2[%c1, %c0_1, %c0_2] : memref<3x4x32xbf16, #tpu.memory_space<vmem>>, vector<1x4x32xbf16>
    %7 = vector.shape_cast %6 : vector<1x4x32xbf16> to vector<4x32xbf16>
    %cst = arith.constant dense<0.000000e+00> : vector<4x32xf32>
    %8 = tpu.matmul %5, %7, %cst {dimension_numbers = #tpu.dot_dimension_numbers<[1], [0], [0], [1], [0, 0, 1, 1], [], []>} : vector<4x4xbf16>, vector<4x32xbf16>, vector<4x32xf32> -> vector<4x32xf32>
    %c1_3 = arith.constant 1 : index
    %c0_4 = arith.constant 0 : index
    %c0_5 = arith.constant 0 : index
    %9 = vector.load %arg3[%c1_3, %c0_4, %c0_5] : memref<3x1x32xf32, #tpu.memory_space<vmem>>, vector<1x1x32xf32>
    %10 = vector.shape_cast %9 : vector<1x1x32xf32> to vector<1x32xf32>
    %11 = vector.broadcast %10 : vector<1x32xf32> to vector<4x32xf32>
    %12 = arith.addf %8, %11 : vector<4x32xf32>
    %cst_6 = arith.constant 0.000000e+00 : f32
    %13 = vector.broadcast %cst_6 : f32 to vector<4x32xf32>
    %14 = arith.maximumf %12, %13 : vector<4x32xf32>
    %15 = arith.truncf %14 : vector<4x32xf32> to vector<4x32xbf16>
    %c1_7 = arith.constant 1 : index
    %c0_8 = arith.constant 0 : index
    %c0_9 = arith.constant 0 : index
    %16 = vector.load %arg4[%c1_7, %c0_8, %c0_9] : memref<3x32x32xbf16, #tpu.memory_space<vmem>>, vector<1x32x32xbf16>
    %17 = vector.shape_cast %16 : vector<1x32x32xbf16> to vector<32x32xbf16>
    %cst_10 = arith.constant dense<0.000000e+00> : vector<4x32xf32>
    %18 = tpu.matmul %15, %17, %cst_10 {dimension_numbers = #tpu.dot_dimension_numbers<[1], [0], [0], [1], [0, 0, 1, 1], [], []>} : vector<4x32xbf16>, vector<32x32xbf16>, vector<4x32xf32> -> vector<4x32xf32>
    %c1_11 = arith.constant 1 : index
    %c0_12 = arith.constant 0 : index
    %c0_13 = arith.constant 0 : index
    %19 = vector.load %arg5[%c1_11, %c0_12, %c0_13] : memref<3x1x32xf32, #tpu.memory_space<vmem>>, vector<1x1x32xf32>
    %20 = vector.shape_cast %19 : vector<1x1x32xf32> to vector<1x32xf32>
    %21 = vector.broadcast %20 : vector<1x32xf32> to vector<4x32xf32>
    %22 = arith.addf %18, %21 : vector<4x32xf32>
    %cst_14 = arith.constant 0.000000e+00 : f32
    %23 = vector.broadcast %cst_14 : f32 to vector<4x32xf32>
    %24 = arith.maximumf %22, %23 : vector<4x32xf32>
    %25 = arith.truncf %24 : vector<4x32xf32> to vector<4x32xbf16>
    %c1_15 = arith.constant 1 : index
    %c0_16 = arith.constant 0 : index
    %c0_17 = arith.constant 0 : index
    %26 = vector.load %arg6[%c1_15, %c0_16, %c0_17] : memref<3x32x4xbf16, #tpu.memory_space<vmem>>, vector<1x32x4xbf16>
    %27 = vector.shape_cast %26 : vector<1x32x4xbf16> to vector<32x4xbf16>
    %cst_18 = arith.constant dense<0.000000e+00> : vector<4x4xf32>
    %28 = tpu.matmul %25, %27, %cst_18 {dimension_numbers = #tpu.dot_dimension_numbers<[1], [0], [0], [1], [0, 0, 1, 1], [], []>} : vector<4x32xbf16>, vector<32x4xbf16>, vector<4x4xf32> -> vector<4x4xf32>
    %c1_19 = arith.constant 1 : index
    %c0_20 = arith.constant 0 : index
    %c0_21 = arith.constant 0 : index
    %29 = vector.load %arg7[%c1_19, %c0_20, %c0_21] : memref<3x1x4xf32, #tpu.memory_space<vmem>>, vector<1x1x4xf32>
    %30 = vector.shape_cast %29 : vector<1x1x4xf32> to vector<1x4xf32>
    %31 = vector.broadcast %30 : vector<1x4xf32> to vector<4x4xf32>
    %32 = arith.addf %28, %31 : vector<4x4xf32>
    %33 = arith.truncf %3 : vector<4x4xf32> to vector<4x4xbf16>
    %c1_22 = arith.constant 1 : index
    %c0_23 = arith.constant 0 : index
    %c0_24 = arith.constant 0 : index
    %34 = vector.load %arg2[%c1_22, %c0_23, %c0_24] : memref<3x4x32xbf16, #tpu.memory_space<vmem>>, vector<1x4x32xbf16>
    %35 = vector.shape_cast %34 : vector<1x4x32xbf16> to vector<4x32xbf16>
    %cst_25 = arith.constant dense<0.000000e+00> : vector<4x32xf32>
    %36 = tpu.matmul %33, %35, %cst_25 {dimension_numbers = #tpu.dot_dimension_numbers<[1], [0], [0], [1], [0, 0, 1, 1], [], []>} : vector<4x4xbf16>, vector<4x32xbf16>, vector<4x32xf32> -> vector<4x32xf32>
    %c1_26 = arith.constant 1 : index
    %c0_27 = arith.constant 0 : index
    %c0_28 = arith.constant 0 : index
    %37 = vector.load %arg3[%c1_26, %c0_27, %c0_28] : memref<3x1x32xf32, #tpu.memory_space<vmem>>, vector<1x1x32xf32>
    %38 = vector.shape_cast %37 : vector<1x1x32xf32> to vector<1x32xf32>
    %39 = vector.broadcast %38 : vector<1x32xf32> to vector<4x32xf32>
    %40 = arith.addf %36, %39 : vector<4x32xf32>
    %cst_29 = arith.constant 0.000000e+00 : f32
    %41 = vector.broadcast %cst_29 : f32 to vector<4x32xf32>
    %42 = arith.maximumf %40, %41 : vector<4x32xf32>
    %43 = arith.truncf %42 : vector<4x32xf32> to vector<4x32xbf16>
    %c1_30 = arith.constant 1 : index
    %c0_31 = arith.constant 0 : index
    %c0_32 = arith.constant 0 : index
    %44 = vector.load %arg4[%c1_30, %c0_31, %c0_32] : memref<3x32x32xbf16, #tpu.memory_space<vmem>>, vector<1x32x32xbf16>
    %45 = vector.shape_cast %44 : vector<1x32x32xbf16> to vector<32x32xbf16>
    %cst_33 = arith.constant dense<0.000000e+00> : vector<4x32xf32>
    %46 = tpu.matmul %43, %45, %cst_33 {dimension_numbers = #tpu.dot_dimension_numbers<[1], [0], [0], [1], [0, 0, 1, 1], [], []>} : vector<4x32xbf16>, vector<32x32xbf16>, vector<4x32xf32> -> vector<4x32xf32>
    %c1_34 = arith.constant 1 : index
    %c0_35 = arith.constant 0 : index
    %c0_36 = arith.constant 0 : index
    %47 = vector.load %arg5[%c1_34, %c0_35, %c0_36] : memref<3x1x32xf32, #tpu.memory_space<vmem>>, vector<1x1x32xf32>
    %48 = vector.shape_cast %47 : vector<1x1x32xf32> to vector<1x32xf32>
    %49 = vector.broadcast %48 : vector<1x32xf32> to vector<4x32xf32>
    %50 = arith.addf %46, %49 : vector<4x32xf32>
    %cst_37 = arith.constant 0.000000e+00 : f32
    %51 = vector.broadcast %cst_37 : f32 to vector<4x32xf32>
    %52 = arith.maximumf %50, %51 : vector<4x32xf32>
    %53 = arith.truncf %52 : vector<4x32xf32> to vector<4x32xbf16>
    %c1_38 = arith.constant 1 : index
    %c0_39 = arith.constant 0 : index
    %c0_40 = arith.constant 0 : index
    %54 = vector.load %arg6[%c1_38, %c0_39, %c0_40] : memref<3x32x4xbf16, #tpu.memory_space<vmem>>, vector<1x32x4xbf16>
    %55 = vector.shape_cast %54 : vector<1x32x4xbf16> to vector<32x4xbf16>
    %cst_41 = arith.constant dense<0.000000e+00> : vector<4x4xf32>
    %56 = tpu.matmul %53, %55, %cst_41 {dimension_numbers = #tpu.dot_dimension_numbers<[1], [0], [0], [1], [0, 0, 1, 1], [], []>} : vector<4x32xbf16>, vector<32x4xbf16>, vector<4x4xf32> -> vector<4x4xf32>
    %c1_42 = arith.constant 1 : index
    %c0_43 = arith.constant 0 : index
    %c0_44 = arith.constant 0 : index
    %57 = vector.load %arg7[%c1_42, %c0_43, %c0_44] : memref<3x1x4xf32, #tpu.memory_space<vmem>>, vector<1x1x4xf32>
    %58 = vector.shape_cast %57 : vector<1x1x4xf32> to vector<1x4xf32>
    %59 = vector.broadcast %58 : vector<1x4xf32> to vector<4x4xf32>
    %60 = arith.addf %56, %59 : vector<4x4xf32>
    %61 = arith.truncf %1 : vector<4x4xf32> to vector<4x4xbf16>
    %c2 = arith.constant 2 : index
    %c0_45 = arith.constant 0 : index
    %c0_46 = arith.constant 0 : index
    %62 = vector.load %arg2[%c2, %c0_45, %c0_46] : memref<3x4x32xbf16, #tpu.memory_space<vmem>>, vector<1x4x32xbf16>
    %63 = vector.shape_cast %62 : vector<1x4x32xbf16> to vector<4x32xbf16>
    %cst_47 = arith.constant dense<0.000000e+00> : vector<4x32xf32>
    %64 = tpu.matmul %61, %63, %cst_47 {dimension_numbers = #tpu.dot_dimension_numbers<[1], [0], [0], [1], [0, 0, 1, 1], [], []>} : vector<4x4xbf16>, vector<4x32xbf16>, vector<4x32xf32> -> vector<4x32xf32>
    %c2_48 = arith.constant 2 : index
    %c0_49 = arith.constant 0 : index
    %c0_50 = arith.constant 0 : index
    %65 = vector.load %arg3[%c2_48, %c0_49, %c0_50] : memref<3x1x32xf32, #tpu.memory_space<vmem>>, vector<1x1x32xf32>
    %66 = vector.shape_cast %65 : vector<1x1x32xf32> to vector<1x32xf32>
    %67 = vector.broadcast %66 : vector<1x32xf32> to vector<4x32xf32>
    %68 = arith.addf %64, %67 : vector<4x32xf32>
    %cst_51 = arith.constant 0.000000e+00 : f32
    %69 = vector.broadcast %cst_51 : f32 to vector<4x32xf32>
    %70 = arith.maximumf %68, %69 : vector<4x32xf32>
    %71 = arith.truncf %70 : vector<4x32xf32> to vector<4x32xbf16>
    %c2_52 = arith.constant 2 : index
    %c0_53 = arith.constant 0 : index
    %c0_54 = arith.constant 0 : index
    %72 = vector.load %arg4[%c2_52, %c0_53, %c0_54] : memref<3x32x32xbf16, #tpu.memory_space<vmem>>, vector<1x32x32xbf16>
    %73 = vector.shape_cast %72 : vector<1x32x32xbf16> to vector<32x32xbf16>
    %cst_55 = arith.constant dense<0.000000e+00> : vector<4x32xf32>
    %74 = tpu.matmul %71, %73, %cst_55 {dimension_numbers = #tpu.dot_dimension_numbers<[1], [0], [0], [1], [0, 0, 1, 1], [], []>} : vector<4x32xbf16>, vector<32x32xbf16>, vector<4x32xf32> -> vector<4x32xf32>
    %c2_56 = arith.constant 2 : index
    %c0_57 = arith.constant 0 : index
    %c0_58 = arith.constant 0 : index
    %75 = vector.load %arg5[%c2_56, %c0_57, %c0_58] : memref<3x1x32xf32, #tpu.memory_space<vmem>>, vector<1x1x32xf32>
    %76 = vector.shape_cast %75 : vector<1x1x32xf32> to vector<1x32xf32>
    %77 = vector.broadcast %76 : vector<1x32xf32> to vector<4x32xf32>
    %78 = arith.addf %74, %77 : vector<4x32xf32>
    %cst_59 = arith.constant 0.000000e+00 : f32
    %79 = vector.broadcast %cst_59 : f32 to vector<4x32xf32>
    %80 = arith.maximumf %78, %79 : vector<4x32xf32>
    %81 = arith.truncf %80 : vector<4x32xf32> to vector<4x32xbf16>
    %c2_60 = arith.constant 2 : index
    %c0_61 = arith.constant 0 : index
    %c0_62 = arith.constant 0 : index
    %82 = vector.load %arg6[%c2_60, %c0_61, %c0_62] : memref<3x32x4xbf16, #tpu.memory_space<vmem>>, vector<1x32x4xbf16>
    %83 = vector.shape_cast %82 : vector<1x32x4xbf16> to vector<32x4xbf16>
    %cst_63 = arith.constant dense<0.000000e+00> : vector<4x4xf32>
    %84 = tpu.matmul %81, %83, %cst_63 {dimension_numbers = #tpu.dot_dimension_numbers<[1], [0], [0], [1], [0, 0, 1, 1], [], []>} : vector<4x32xbf16>, vector<32x4xbf16>, vector<4x4xf32> -> vector<4x4xf32>
    %c2_64 = arith.constant 2 : index
    %c0_65 = arith.constant 0 : index
    %c0_66 = arith.constant 0 : index
    %85 = vector.load %arg7[%c2_64, %c0_65, %c0_66] : memref<3x1x4xf32, #tpu.memory_space<vmem>>, vector<1x1x4xf32>
    %86 = vector.shape_cast %85 : vector<1x1x4xf32> to vector<1x4xf32>
    %87 = vector.broadcast %86 : vector<1x4xf32> to vector<4x4xf32>
    %88 = arith.addf %84, %87 : vector<4x4xf32>
    %89 = tpu.concatenate %1, %2, %3, %4 in 0 : vector<4x4xf32>, vector<4x4xf32>, vector<4x4xf32>, vector<4x4xf32> -> vector<16x4xf32>
    %90 = arith.truncf %89 : vector<16x4xf32> to vector<16x4xbf16>
    %c0_67 = arith.constant 0 : index
    %c0_68 = arith.constant 0 : index
    %c0_69 = arith.constant 0 : index
    %91 = vector.load %arg2[%c0_67, %c0_68, %c0_69] : memref<3x4x32xbf16, #tpu.memory_space<vmem>>, vector<1x4x32xbf16>
    %92 = vector.shape_cast %91 : vector<1x4x32xbf16> to vector<4x32xbf16>
    %cst_70 = arith.constant dense<0.000000e+00> : vector<16x32xf32>
    %93 = tpu.matmul %90, %92, %cst_70 {dimension_numbers = #tpu.dot_dimension_numbers<[1], [0], [0], [1], [0, 0, 1, 1], [], []>} : vector<16x4xbf16>, vector<4x32xbf16>, vector<16x32xf32> -> vector<16x32xf32>
    %c0_71 = arith.constant 0 : index
    %c0_72 = arith.constant 0 : index
    %c0_73 = arith.constant 0 : index
    %94 = vector.load %arg3[%c0_71, %c0_72, %c0_73] : memref<3x1x32xf32, #tpu.memory_space<vmem>>, vector<1x1x32xf32>
    %95 = vector.shape_cast %94 : vector<1x1x32xf32> to vector<1x32xf32>
    %96 = vector.broadcast %95 : vector<1x32xf32> to vector<16x32xf32>
    %97 = arith.addf %93, %96 : vector<16x32xf32>
    %cst_74 = arith.constant 0.000000e+00 : f32
    %98 = vector.broadcast %cst_74 : f32 to vector<16x32xf32>
    %99 = arith.maximumf %97, %98 : vector<16x32xf32>
    %100 = arith.truncf %99 : vector<16x32xf32> to vector<16x32xbf16>
    %c0_75 = arith.constant 0 : index
    %c0_76 = arith.constant 0 : index
    %c0_77 = arith.constant 0 : index
    %101 = vector.load %arg4[%c0_75, %c0_76, %c0_77] : memref<3x32x32xbf16, #tpu.memory_space<vmem>>, vector<1x32x32xbf16>
    %102 = vector.shape_cast %101 : vector<1x32x32xbf16> to vector<32x32xbf16>
    %cst_78 = arith.constant dense<0.000000e+00> : vector<16x32xf32>
    %103 = tpu.matmul %100, %102, %cst_78 {dimension_numbers = #tpu.dot_dimension_numbers<[1], [0], [0], [1], [0, 0, 1, 1], [], []>} : vector<16x32xbf16>, vector<32x32xbf16>, vector<16x32xf32> -> vector<16x32xf32>
    %c0_79 = arith.constant 0 : index
    %c0_80 = arith.constant 0 : index
    %c0_81 = arith.constant 0 : index
    %104 = vector.load %arg5[%c0_79, %c0_80, %c0_81] : memref<3x1x32xf32, #tpu.memory_space<vmem>>, vector<1x1x32xf32>
    %105 = vector.shape_cast %104 : vector<1x1x32xf32> to vector<1x32xf32>
    %106 = vector.broadcast %105 : vector<1x32xf32> to vector<16x32xf32>
    %107 = arith.addf %103, %106 : vector<16x32xf32>
    %cst_82 = arith.constant 0.000000e+00 : f32
    %108 = vector.broadcast %cst_82 : f32 to vector<16x32xf32>
    %109 = arith.maximumf %107, %108 : vector<16x32xf32>
    %110 = arith.truncf %109 : vector<16x32xf32> to vector<16x32xbf16>
    %c0_83 = arith.constant 0 : index
    %c0_84 = arith.constant 0 : index
    %c0_85 = arith.constant 0 : index
    %111 = vector.load %arg6[%c0_83, %c0_84, %c0_85] : memref<3x32x4xbf16, #tpu.memory_space<vmem>>, vector<1x32x4xbf16>
    %112 = vector.shape_cast %111 : vector<1x32x4xbf16> to vector<32x4xbf16>
    %cst_86 = arith.constant dense<0.000000e+00> : vector<16x4xf32>
    %113 = tpu.matmul %110, %112, %cst_86 {dimension_numbers = #tpu.dot_dimension_numbers<[1], [0], [0], [1], [0, 0, 1, 1], [], []>} : vector<16x32xbf16>, vector<32x4xbf16>, vector<16x4xf32> -> vector<16x4xf32>
    %c0_87 = arith.constant 0 : index
    %c0_88 = arith.constant 0 : index
    %c0_89 = arith.constant 0 : index
    %114 = vector.load %arg7[%c0_87, %c0_88, %c0_89] : memref<3x1x4xf32, #tpu.memory_space<vmem>>, vector<1x1x4xf32>
    %115 = vector.shape_cast %114 : vector<1x1x4xf32> to vector<1x4xf32>
    %116 = vector.broadcast %115 : vector<1x4xf32> to vector<16x4xf32>
    %117 = arith.addf %113, %116 : vector<16x4xf32>
    %118 = tpu.iota {dimensions = array<i32: 0>} : vector<4x1xi32>
    %c2_i32 = arith.constant 2 : i32
    %c0_i32 = arith.constant 0 : i32
    %119 = arith.cmpi eq, %c2_i32, %c0_i32 : i32
    %c1_i32 = arith.constant 1 : i32
    %120 = arith.select %119, %c1_i32, %c2_i32 : i32
    %121 = vector.broadcast %120 : i32 to vector<4x1xi32>
    %122 = arith.remsi %118, %121 : vector<4x1xi32>
    %c0_i32_90 = arith.constant 0 : i32
    %123 = vector.broadcast %c0_i32_90 : i32 to vector<4x1xi32>
    %124 = arith.cmpi ne, %122, %123 : vector<4x1xi32>
    %c0_i32_91 = arith.constant 0 : i32
    %125 = vector.broadcast %c0_i32_91 : i32 to vector<4x1xi32>
    %126 = arith.cmpi slt, %122, %125 : vector<4x1xi32>
    %c0_i32_92 = arith.constant 0 : i32
    %127 = arith.cmpi slt, %120, %c0_i32_92 : i32
    %128 = vector.broadcast %127 : i1 to vector<4x1xi1>
    %129 = vector.broadcast %128 : vector<4x1xi1> to vector<4x1xi1>
    %130 = arith.xori %126, %129 : vector<4x1xi1>
    %131 = arith.andi %130, %124 : vector<4x1xi1>
    %132 = vector.broadcast %120 : i32 to vector<4x1xi32>
    %133 = arith.addi %122, %132 : vector<4x1xi32>
    %134 = arith.select %131, %133, %122 : vector<4x1xi1>, vector<4x1xi32>
    %c0_i32_93 = arith.constant 0 : i32
    %135 = vector.broadcast %c0_i32_93 : i32 to vector<4x1xi32>
    %136 = arith.cmpi eq, %134, %135 : vector<4x1xi32>
    %c1_i32_94 = arith.constant 1 : i32
    %137 = vector.broadcast %c1_i32_94 : i32 to vector<4x1xi32>
    %138 = arith.cmpi eq, %134, %137 : vector<4x1xi32>
    %139 = vector.extract_strided_slice %88 {offsets = [0, 0], sizes = [1, 4], strides = [1, 1]} : vector<4x4xf32> to vector<1x4xf32>
    %140 = vector.extract_strided_slice %88 {offsets = [0, 0], sizes = [3, 4], strides = [1, 1]} : vector<4x4xf32> to vector<3x4xf32>
    %141 = tpu.concatenate %139, %140 in 0 : vector<1x4xf32>, vector<3x4xf32> -> vector<4x4xf32>
    %142 = vector.shape_cast %136 : vector<4x1xi1> to vector<4x1xi1>
    %143 = vector.broadcast %142 : vector<4x1xi1> to vector<4x4xi1>
    %144 = arith.select %143, %88, %141 : vector<4x4xi1>, vector<4x4xf32>
    %145 = vector.extract_strided_slice %88 {offsets = [1, 0], sizes = [3, 4], strides = [1, 1]} : vector<4x4xf32> to vector<3x4xf32>
    %146 = vector.extract_strided_slice %88 {offsets = [3, 0], sizes = [1, 4], strides = [1, 1]} : vector<4x4xf32> to vector<1x4xf32>
    %147 = tpu.concatenate %145, %146 in 0 : vector<3x4xf32>, vector<1x4xf32> -> vector<4x4xf32>
    %148 = vector.shape_cast %138 : vector<4x1xi1> to vector<4x1xi1>
    %149 = vector.broadcast %148 : vector<4x1xi1> to vector<4x4xi1>
    %150 = arith.select %149, %88, %147 : vector<4x4xi1>, vector<4x4xf32>
    %151 = vector.extract_strided_slice %117 {offsets = [0, 0], sizes = [4, 4], strides = [1, 1]} : vector<16x4xf32> to vector<4x4xf32>
    %152 = vector.extract_strided_slice %60 {offsets = [0, 0], sizes = [1, 4], strides = [1, 1]} : vector<4x4xf32> to vector<1x4xf32>
    %153 = vector.extract_strided_slice %60 {offsets = [0, 0], sizes = [3, 4], strides = [1, 1]} : vector<4x4xf32> to vector<3x4xf32>
    %154 = tpu.concatenate %152, %153 in 0 : vector<1x4xf32>, vector<3x4xf32> -> vector<4x4xf32>
    %155 = vector.shape_cast %136 : vector<4x1xi1> to vector<4x1xi1>
    %156 = vector.broadcast %155 : vector<4x1xi1> to vector<4x4xi1>
    %157 = arith.select %156, %32, %154 : vector<4x4xi1>, vector<4x4xf32>
    %cst_95 = arith.constant 2.500000e-01 : f32
    %158 = vector.broadcast %cst_95 : f32 to vector<4x4xf32>
    %159 = arith.mulf %158, %157 : vector<4x4xf32>
    %cst_96 = arith.constant 7.500000e-01 : f32
    %160 = vector.broadcast %cst_96 : f32 to vector<4x4xf32>
    %161 = arith.mulf %160, %32 : vector<4x4xf32>
    %162 = arith.addf %159, %161 : vector<4x4xf32>
    %cst_97 = arith.constant 3.750000e-01 : f32
    %163 = vector.broadcast %cst_97 : f32 to vector<4x4xf32>
    %164 = arith.mulf %163, %144 : vector<4x4xf32>
    %cst_98 = arith.constant 6.250000e-01 : f32
    %165 = vector.broadcast %cst_98 : f32 to vector<4x4xf32>
    %166 = arith.mulf %165, %88 : vector<4x4xf32>
    %167 = arith.addf %164, %166 : vector<4x4xf32>
    %168 = arith.truncf %151 : vector<4x4xf32> to vector<4x4xbf16>
    %c0_99 = arith.constant 0 : index
    %c0_100 = arith.constant 0 : index
    %c0_101 = arith.constant 0 : index
    %169 = vector.load %arg8[%c0_99, %c0_100, %c0_101] : memref<3x4x32xbf16, #tpu.memory_space<vmem>>, vector<1x4x32xbf16>
    %170 = vector.shape_cast %169 : vector<1x4x32xbf16> to vector<4x32xbf16>
    %cst_102 = arith.constant dense<0.000000e+00> : vector<4x32xf32>
    %171 = tpu.matmul %168, %170, %cst_102 {dimension_numbers = #tpu.dot_dimension_numbers<[1], [0], [0], [1], [0, 0, 1, 1], [], []>} : vector<4x4xbf16>, vector<4x32xbf16>, vector<4x32xf32> -> vector<4x32xf32>
    %172 = arith.truncf %162 : vector<4x4xf32> to vector<4x4xbf16>
    %c1_103 = arith.constant 1 : index
    %c0_104 = arith.constant 0 : index
    %c0_105 = arith.constant 0 : index
    %173 = vector.load %arg8[%c1_103, %c0_104, %c0_105] : memref<3x4x32xbf16, #tpu.memory_space<vmem>>, vector<1x4x32xbf16>
    %174 = vector.shape_cast %173 : vector<1x4x32xbf16> to vector<4x32xbf16>
    %cst_106 = arith.constant dense<0.000000e+00> : vector<4x32xf32>
    %175 = tpu.matmul %172, %174, %cst_106 {dimension_numbers = #tpu.dot_dimension_numbers<[1], [0], [0], [1], [0, 0, 1, 1], [], []>} : vector<4x4xbf16>, vector<4x32xbf16>, vector<4x32xf32> -> vector<4x32xf32>
    %176 = arith.addf %171, %175 : vector<4x32xf32>
    %177 = arith.truncf %167 : vector<4x4xf32> to vector<4x4xbf16>
    %c2_107 = arith.constant 2 : index
    %c0_108 = arith.constant 0 : index
    %c0_109 = arith.constant 0 : index
    %178 = vector.load %arg8[%c2_107, %c0_108, %c0_109] : memref<3x4x32xbf16, #tpu.memory_space<vmem>>, vector<1x4x32xbf16>
    %179 = vector.shape_cast %178 : vector<1x4x32xbf16> to vector<4x32xbf16>
    %cst_110 = arith.constant dense<0.000000e+00> : vector<4x32xf32>
    %180 = tpu.matmul %177, %179, %cst_110 {dimension_numbers = #tpu.dot_dimension_numbers<[1], [0], [0], [1], [0, 0, 1, 1], [], []>} : vector<4x4xbf16>, vector<4x32xbf16>, vector<4x32xf32> -> vector<4x32xf32>
    %181 = arith.addf %176, %180 : vector<4x32xf32>
    %c0_111 = arith.constant 0 : index
    %c0_112 = arith.constant 0 : index
    %182 = vector.load %arg9[%c0_111, %c0_112] : memref<1x32xf32, #tpu.memory_space<vmem>>, vector<1x32xf32>
    %183 = vector.broadcast %182 : vector<1x32xf32> to vector<4x32xf32>
    %184 = arith.addf %181, %183 : vector<4x32xf32>
    %cst_113 = arith.constant 0.000000e+00 : f32
    %185 = vector.broadcast %cst_113 : f32 to vector<4x32xf32>
    %186 = arith.maximumf %184, %185 : vector<4x32xf32>
    %187 = arith.truncf %186 : vector<4x32xf32> to vector<4x32xbf16>
    %c0_114 = arith.constant 0 : index
    %c0_115 = arith.constant 0 : index
    %188 = vector.load %arg10[%c0_114, %c0_115] : memref<32x128xbf16, #tpu.memory_space<vmem>>, vector<32x128xbf16>
    %cst_116 = arith.constant dense<0.000000e+00> : vector<4x128xf32>
    %189 = tpu.matmul %187, %188, %cst_116 {dimension_numbers = #tpu.dot_dimension_numbers<[1], [0], [0], [1], [0, 0, 1, 1], [], []>} : vector<4x32xbf16>, vector<32x128xbf16>, vector<4x128xf32> -> vector<4x128xf32>
    %c0_117 = arith.constant 0 : index
    %c0_118 = arith.constant 0 : index
    %190 = vector.load %arg11[%c0_117, %c0_118] : memref<1x128xf32, #tpu.memory_space<vmem>>, vector<1x128xf32>
    %191 = vector.broadcast %190 : vector<1x128xf32> to vector<4x128xf32>
    %192 = arith.addf %189, %191 : vector<4x128xf32>
    %193 = vector.extract_strided_slice %192 {offsets = [0, 0], sizes = [4, 1], strides = [1, 1]} : vector<4x128xf32> to vector<4x1xf32>
    %194 = vector.extract_strided_slice %192 {offsets = [0, 1], sizes = [4, 1], strides = [1, 1]} : vector<4x128xf32> to vector<4x1xf32>
    %195 = vector.extract_strided_slice %192 {offsets = [0, 2], sizes = [4, 1], strides = [1, 1]} : vector<4x128xf32> to vector<4x1xf32>
    %196 = arith.maximumf %193, %194 : vector<4x1xf32>
    %197 = arith.maximumf %196, %195 : vector<4x1xf32>
    %198 = arith.subf %193, %197 : vector<4x1xf32>
    %199 = math.exp %198 : vector<4x1xf32>
    %200 = arith.subf %194, %197 : vector<4x1xf32>
    %201 = math.exp %200 : vector<4x1xf32>
    %202 = arith.subf %195, %197 : vector<4x1xf32>
    %203 = math.exp %202 : vector<4x1xf32>
    %204 = arith.addf %199, %201 : vector<4x1xf32>
    %205 = arith.addf %204, %203 : vector<4x1xf32>
    %206 = tpu.reciprocal %205 {approx = true} : vector<4x1xf32> -> vector<4x1xf32>
    %207 = vector.broadcast %199 : vector<4x1xf32> to vector<4x4xf32>
    %208 = arith.mulf %207, %151 : vector<4x4xf32>
    %209 = vector.broadcast %201 : vector<4x1xf32> to vector<4x4xf32>
    %210 = arith.mulf %209, %162 : vector<4x4xf32>
    %211 = arith.addf %208, %210 : vector<4x4xf32>
    %212 = vector.broadcast %203 : vector<4x1xf32> to vector<4x4xf32>
    %213 = arith.mulf %212, %167 : vector<4x4xf32>
    %214 = arith.addf %211, %213 : vector<4x4xf32>
    %215 = vector.broadcast %206 : vector<4x1xf32> to vector<4x4xf32>
    %216 = arith.mulf %214, %215 : vector<4x4xf32>
    %c0_119 = arith.constant 0 : index
    %c0_120 = arith.constant 0 : index
    %217 = vector.load %arg12[%c0_119, %c0_120] : memref<4x16xf32, #tpu.memory_space<vmem>>, vector<4x4xf32>
    tpu.vector_store %arg12[%c0_119, %c0_120], %216 {strides = array<i32>} : memref<4x16xf32, #tpu.memory_space<vmem>>, vector<4x4xf32>,
    %218 = vector.extract_strided_slice %117 {offsets = [4, 0], sizes = [4, 4], strides = [1, 1]} : vector<16x4xf32> to vector<4x4xf32>
    %cst_121 = arith.constant 7.500000e-01 : f32
    %219 = vector.broadcast %cst_121 : f32 to vector<4x4xf32>
    %220 = arith.mulf %219, %32 : vector<4x4xf32>
    %cst_122 = arith.constant 2.500000e-01 : f32
    %221 = vector.broadcast %cst_122 : f32 to vector<4x4xf32>
    %222 = arith.mulf %221, %60 : vector<4x4xf32>
    %223 = arith.addf %220, %222 : vector<4x4xf32>
    %cst_123 = arith.constant 1.250000e-01 : f32
    %224 = vector.broadcast %cst_123 : f32 to vector<4x4xf32>
    %225 = arith.mulf %224, %144 : vector<4x4xf32>
    %cst_124 = arith.constant 8.750000e-01 : f32
    %226 = vector.broadcast %cst_124 : f32 to vector<4x4xf32>
    %227 = arith.mulf %226, %88 : vector<4x4xf32>
    %228 = arith.addf %225, %227 : vector<4x4xf32>
    %229 = arith.truncf %218 : vector<4x4xf32> to vector<4x4xbf16>
    %c0_125 = arith.constant 0 : index
    %c0_126 = arith.constant 0 : index
    %c0_127 = arith.constant 0 : index
    %230 = vector.load %arg8[%c0_125, %c0_126, %c0_127] : memref<3x4x32xbf16, #tpu.memory_space<vmem>>, vector<1x4x32xbf16>
    %231 = vector.shape_cast %230 : vector<1x4x32xbf16> to vector<4x32xbf16>
    %cst_128 = arith.constant dense<0.000000e+00> : vector<4x32xf32>
    %232 = tpu.matmul %229, %231, %cst_128 {dimension_numbers = #tpu.dot_dimension_numbers<[1], [0], [0], [1], [0, 0, 1, 1], [], []>} : vector<4x4xbf16>, vector<4x32xbf16>, vector<4x32xf32> -> vector<4x32xf32>
    %233 = arith.truncf %223 : vector<4x4xf32> to vector<4x4xbf16>
    %c1_129 = arith.constant 1 : index
    %c0_130 = arith.constant 0 : index
    %c0_131 = arith.constant 0 : index
    %234 = vector.load %arg8[%c1_129, %c0_130, %c0_131] : memref<3x4x32xbf16, #tpu.memory_space<vmem>>, vector<1x4x32xbf16>
    %235 = vector.shape_cast %234 : vector<1x4x32xbf16> to vector<4x32xbf16>
    %cst_132 = arith.constant dense<0.000000e+00> : vector<4x32xf32>
    %236 = tpu.matmul %233, %235, %cst_132 {dimension_numbers = #tpu.dot_dimension_numbers<[1], [0], [0], [1], [0, 0, 1, 1], [], []>} : vector<4x4xbf16>, vector<4x32xbf16>, vector<4x32xf32> -> vector<4x32xf32>
    %237 = arith.addf %232, %236 : vector<4x32xf32>
    %238 = arith.truncf %228 : vector<4x4xf32> to vector<4x4xbf16>
    %c2_133 = arith.constant 2 : index
    %c0_134 = arith.constant 0 : index
    %c0_135 = arith.constant 0 : index
    %239 = vector.load %arg8[%c2_133, %c0_134, %c0_135] : memref<3x4x32xbf16, #tpu.memory_space<vmem>>, vector<1x4x32xbf16>
    %240 = vector.shape_cast %239 : vector<1x4x32xbf16> to vector<4x32xbf16>
    %cst_136 = arith.constant dense<0.000000e+00> : vector<4x32xf32>
    %241 = tpu.matmul %238, %240, %cst_136 {dimension_numbers = #tpu.dot_dimension_numbers<[1], [0], [0], [1], [0, 0, 1, 1], [], []>} : vector<4x4xbf16>, vector<4x32xbf16>, vector<4x32xf32> -> vector<4x32xf32>
    %242 = arith.addf %237, %241 : vector<4x32xf32>
    %c0_137 = arith.constant 0 : index
    %c0_138 = arith.constant 0 : index
    %243 = vector.load %arg9[%c0_137, %c0_138] : memref<1x32xf32, #tpu.memory_space<vmem>>, vector<1x32xf32>
    %244 = vector.broadcast %243 : vector<1x32xf32> to vector<4x32xf32>
    %245 = arith.addf %242, %244 : vector<4x32xf32>
    %cst_139 = arith.constant 0.000000e+00 : f32
    %246 = vector.broadcast %cst_139 : f32 to vector<4x32xf32>
    %247 = arith.maximumf %245, %246 : vector<4x32xf32>
    %248 = arith.truncf %247 : vector<4x32xf32> to vector<4x32xbf16>
    %c0_140 = arith.constant 0 : index
    %c0_141 = arith.constant 0 : index
    %249 = vector.load %arg10[%c0_140, %c0_141] : memref<32x128xbf16, #tpu.memory_space<vmem>>, vector<32x128xbf16>
    %cst_142 = arith.constant dense<0.000000e+00> : vector<4x128xf32>
    %250 = tpu.matmul %248, %249, %cst_142 {dimension_numbers = #tpu.dot_dimension_numbers<[1], [0], [0], [1], [0, 0, 1, 1], [], []>} : vector<4x32xbf16>, vector<32x128xbf16>, vector<4x128xf32> -> vector<4x128xf32>
    %c0_143 = arith.constant 0 : index
    %c0_144 = arith.constant 0 : index
    %251 = vector.load %arg11[%c0_143, %c0_144] : memref<1x128xf32, #tpu.memory_space<vmem>>, vector<1x128xf32>
    %252 = vector.broadcast %251 : vector<1x128xf32> to vector<4x128xf32>
    %253 = arith.addf %250, %252 : vector<4x128xf32>
    %254 = vector.extract_strided_slice %253 {offsets = [0, 0], sizes = [4, 1], strides = [1, 1]} : vector<4x128xf32> to vector<4x1xf32>
    %255 = vector.extract_strided_slice %253 {offsets = [0, 1], sizes = [4, 1], strides = [1, 1]} : vector<4x128xf32> to vector<4x1xf32>
    %256 = vector.extract_strided_slice %253 {offsets = [0, 2], sizes = [4, 1], strides = [1, 1]} : vector<4x128xf32> to vector<4x1xf32>
    %257 = arith.maximumf %254, %255 : vector<4x1xf32>
    %258 = arith.maximumf %257, %256 : vector<4x1xf32>
    %259 = arith.subf %254, %258 : vector<4x1xf32>
    %260 = math.exp %259 : vector<4x1xf32>
    %261 = arith.subf %255, %258 : vector<4x1xf32>
    %262 = math.exp %261 : vector<4x1xf32>
    %263 = arith.subf %256, %258 : vector<4x1xf32>
    %264 = math.exp %263 : vector<4x1xf32>
    %265 = arith.addf %260, %262 : vector<4x1xf32>
    %266 = arith.addf %265, %264 : vector<4x1xf32>
    %267 = tpu.reciprocal %266 {approx = true} : vector<4x1xf32> -> vector<4x1xf32>
    %268 = vector.broadcast %260 : vector<4x1xf32> to vector<4x4xf32>
    %269 = arith.mulf %268, %218 : vector<4x4xf32>
    %270 = vector.broadcast %262 : vector<4x1xf32> to vector<4x4xf32>
    %271 = arith.mulf %270, %223 : vector<4x4xf32>
    %272 = arith.addf %269, %271 : vector<4x4xf32>
    %273 = vector.broadcast %264 : vector<4x1xf32> to vector<4x4xf32>
    %274 = arith.mulf %273, %228 : vector<4x4xf32>
    %275 = arith.addf %272, %274 : vector<4x4xf32>
    %276 = vector.broadcast %267 : vector<4x1xf32> to vector<4x4xf32>
    %277 = arith.mulf %275, %276 : vector<4x4xf32>
    %c0_145 = arith.constant 0 : index
    %c4 = arith.constant 4 : index
    %278 = vector.load %arg12[%c0_145, %c4] : memref<4x16xf32, #tpu.memory_space<vmem>>, vector<4x4xf32>
    tpu.vector_store %arg12[%c0_145, %c4], %277 {strides = array<i32>} : memref<4x16xf32, #tpu.memory_space<vmem>>, vector<4x4xf32>,
    %279 = vector.extract_strided_slice %117 {offsets = [8, 0], sizes = [4, 4], strides = [1, 1]} : vector<16x4xf32> to vector<4x4xf32>
    %cst_146 = arith.constant 2.500000e-01 : f32
    %280 = vector.broadcast %cst_146 : f32 to vector<4x4xf32>
    %281 = arith.mulf %280, %32 : vector<4x4xf32>
    %cst_147 = arith.constant 7.500000e-01 : f32
    %282 = vector.broadcast %cst_147 : f32 to vector<4x4xf32>
    %283 = arith.mulf %282, %60 : vector<4x4xf32>
    %284 = arith.addf %281, %283 : vector<4x4xf32>
    %cst_148 = arith.constant 8.750000e-01 : f32
    %285 = vector.broadcast %cst_148 : f32 to vector<4x4xf32>
    %286 = arith.mulf %285, %88 : vector<4x4xf32>
    %cst_149 = arith.constant 1.250000e-01 : f32
    %287 = vector.broadcast %cst_149 : f32 to vector<4x4xf32>
    %288 = arith.mulf %287, %150 : vector<4x4xf32>
    %289 = arith.addf %286, %288 : vector<4x4xf32>
    %290 = arith.truncf %279 : vector<4x4xf32> to vector<4x4xbf16>
    %c0_150 = arith.constant 0 : index
    %c0_151 = arith.constant 0 : index
    %c0_152 = arith.constant 0 : index
    %291 = vector.load %arg8[%c0_150, %c0_151, %c0_152] : memref<3x4x32xbf16, #tpu.memory_space<vmem>>, vector<1x4x32xbf16>
    %292 = vector.shape_cast %291 : vector<1x4x32xbf16> to vector<4x32xbf16>
    %cst_153 = arith.constant dense<0.000000e+00> : vector<4x32xf32>
    %293 = tpu.matmul %290, %292, %cst_153 {dimension_numbers = #tpu.dot_dimension_numbers<[1], [0], [0], [1], [0, 0, 1, 1], [], []>} : vector<4x4xbf16>, vector<4x32xbf16>, vector<4x32xf32> -> vector<4x32xf32>
    %294 = arith.truncf %284 : vector<4x4xf32> to vector<4x4xbf16>
    %c1_154 = arith.constant 1 : index
    %c0_155 = arith.constant 0 : index
    %c0_156 = arith.constant 0 : index
    %295 = vector.load %arg8[%c1_154, %c0_155, %c0_156] : memref<3x4x32xbf16, #tpu.memory_space<vmem>>, vector<1x4x32xbf16>
    %296 = vector.shape_cast %295 : vector<1x4x32xbf16> to vector<4x32xbf16>
    %cst_157 = arith.constant dense<0.000000e+00> : vector<4x32xf32>
    %297 = tpu.matmul %294, %296, %cst_157 {dimension_numbers = #tpu.dot_dimension_numbers<[1], [0], [0], [1], [0, 0, 1, 1], [], []>} : vector<4x4xbf16>, vector<4x32xbf16>, vector<4x32xf32> -> vector<4x32xf32>
    %298 = arith.addf %293, %297 : vector<4x32xf32>
    %299 = arith.truncf %289 : vector<4x4xf32> to vector<4x4xbf16>
    %c2_158 = arith.constant 2 : index
    %c0_159 = arith.constant 0 : index
    %c0_160 = arith.constant 0 : index
    %300 = vector.load %arg8[%c2_158, %c0_159, %c0_160] : memref<3x4x32xbf16, #tpu.memory_space<vmem>>, vector<1x4x32xbf16>
    %301 = vector.shape_cast %300 : vector<1x4x32xbf16> to vector<4x32xbf16>
    %cst_161 = arith.constant dense<0.000000e+00> : vector<4x32xf32>
    %302 = tpu.matmul %299, %301, %cst_161 {dimension_numbers = #tpu.dot_dimension_numbers<[1], [0], [0], [1], [0, 0, 1, 1], [], []>} : vector<4x4xbf16>, vector<4x32xbf16>, vector<4x32xf32> -> vector<4x32xf32>
    %303 = arith.addf %298, %302 : vector<4x32xf32>
    %c0_162 = arith.constant 0 : index
    %c0_163 = arith.constant 0 : index
    %304 = vector.load %arg9[%c0_162, %c0_163] : memref<1x32xf32, #tpu.memory_space<vmem>>, vector<1x32xf32>
    %305 = vector.broadcast %304 : vector<1x32xf32> to vector<4x32xf32>
    %306 = arith.addf %303, %305 : vector<4x32xf32>
    %cst_164 = arith.constant 0.000000e+00 : f32
    %307 = vector.broadcast %cst_164 : f32 to vector<4x32xf32>
    %308 = arith.maximumf %306, %307 : vector<4x32xf32>
    %309 = arith.truncf %308 : vector<4x32xf32> to vector<4x32xbf16>
    %c0_165 = arith.constant 0 : index
    %c0_166 = arith.constant 0 : index
    %310 = vector.load %arg10[%c0_165, %c0_166] : memref<32x128xbf16, #tpu.memory_space<vmem>>, vector<32x128xbf16>
    %cst_167 = arith.constant dense<0.000000e+00> : vector<4x128xf32>
    %311 = tpu.matmul %309, %310, %cst_167 {dimension_numbers = #tpu.dot_dimension_numbers<[1], [0], [0], [1], [0, 0, 1, 1], [], []>} : vector<4x32xbf16>, vector<32x128xbf16>, vector<4x128xf32> -> vector<4x128xf32>
    %c0_168 = arith.constant 0 : index
    %c0_169 = arith.constant 0 : index
    %312 = vector.load %arg11[%c0_168, %c0_169] : memref<1x128xf32, #tpu.memory_space<vmem>>, vector<1x128xf32>
    %313 = vector.broadcast %312 : vector<1x128xf32> to vector<4x128xf32>
    %314 = arith.addf %311, %313 : vector<4x128xf32>
    %315 = vector.extract_strided_slice %314 {offsets = [0, 0], sizes = [4, 1], strides = [1, 1]} : vector<4x128xf32> to vector<4x1xf32>
    %316 = vector.extract_strided_slice %314 {offsets = [0, 1], sizes = [4, 1], strides = [1, 1]} : vector<4x128xf32> to vector<4x1xf32>
    %317 = vector.extract_strided_slice %314 {offsets = [0, 2], sizes = [4, 1], strides = [1, 1]} : vector<4x128xf32> to vector<4x1xf32>
    %318 = arith.maximumf %315, %316 : vector<4x1xf32>
    %319 = arith.maximumf %318, %317 : vector<4x1xf32>
    %320 = arith.subf %315, %319 : vector<4x1xf32>
    %321 = math.exp %320 : vector<4x1xf32>
    %322 = arith.subf %316, %319 : vector<4x1xf32>
    %323 = math.exp %322 : vector<4x1xf32>
    %324 = arith.subf %317, %319 : vector<4x1xf32>
    %325 = math.exp %324 : vector<4x1xf32>
    %326 = arith.addf %321, %323 : vector<4x1xf32>
    %327 = arith.addf %326, %325 : vector<4x1xf32>
    %328 = tpu.reciprocal %327 {approx = true} : vector<4x1xf32> -> vector<4x1xf32>
    %329 = vector.broadcast %321 : vector<4x1xf32> to vector<4x4xf32>
    %330 = arith.mulf %329, %279 : vector<4x4xf32>
    %331 = vector.broadcast %323 : vector<4x1xf32> to vector<4x4xf32>
    %332 = arith.mulf %331, %284 : vector<4x4xf32>
    %333 = arith.addf %330, %332 : vector<4x4xf32>
    %334 = vector.broadcast %325 : vector<4x1xf32> to vector<4x4xf32>
    %335 = arith.mulf %334, %289 : vector<4x4xf32>
    %336 = arith.addf %333, %335 : vector<4x4xf32>
    %337 = vector.broadcast %328 : vector<4x1xf32> to vector<4x4xf32>
    %338 = arith.mulf %336, %337 : vector<4x4xf32>
    %c0_170 = arith.constant 0 : index
    %c8 = arith.constant 8 : index
    %339 = vector.load %arg12[%c0_170, %c8] : memref<4x16xf32, #tpu.memory_space<vmem>>, vector<4x4xf32>
    tpu.vector_store %arg12[%c0_170, %c8], %338 {strides = array<i32>} : memref<4x16xf32, #tpu.memory_space<vmem>>, vector<4x4xf32>,
    %340 = vector.extract_strided_slice %117 {offsets = [12, 0], sizes = [4, 4], strides = [1, 1]} : vector<16x4xf32> to vector<4x4xf32>
    %cst_171 = arith.constant 7.500000e-01 : f32
    %341 = vector.broadcast %cst_171 : f32 to vector<4x4xf32>
    %342 = arith.mulf %341, %60 : vector<4x4xf32>
    %343 = vector.extract_strided_slice %32 {offsets = [1, 0], sizes = [3, 4], strides = [1, 1]} : vector<4x4xf32> to vector<3x4xf32>
    %344 = vector.extract_strided_slice %32 {offsets = [3, 0], sizes = [1, 4], strides = [1, 1]} : vector<4x4xf32> to vector<1x4xf32>
    %345 = tpu.concatenate %343, %344 in 0 : vector<3x4xf32>, vector<1x4xf32> -> vector<4x4xf32>
    %346 = vector.shape_cast %138 : vector<4x1xi1> to vector<4x1xi1>
    %347 = vector.broadcast %346 : vector<4x1xi1> to vector<4x4xi1>
    %348 = arith.select %347, %60, %345 : vector<4x4xi1>, vector<4x4xf32>
    %cst_172 = arith.constant 2.500000e-01 : f32
    %349 = vector.broadcast %cst_172 : f32 to vector<4x4xf32>
    %350 = arith.mulf %349, %348 : vector<4x4xf32>
    %351 = arith.addf %342, %350 : vector<4x4xf32>
    %cst_173 = arith.constant 6.250000e-01 : f32
    %352 = vector.broadcast %cst_173 : f32 to vector<4x4xf32>
    %353 = arith.mulf %352, %88 : vector<4x4xf32>
    %cst_174 = arith.constant 3.750000e-01 : f32
    %354 = vector.broadcast %cst_174 : f32 to vector<4x4xf32>
    %355 = arith.mulf %354, %150 : vector<4x4xf32>
    %356 = arith.addf %353, %355 : vector<4x4xf32>
    %357 = arith.truncf %340 : vector<4x4xf32> to vector<4x4xbf16>
    %c0_175 = arith.constant 0 : index
    %c0_176 = arith.constant 0 : index
    %c0_177 = arith.constant 0 : index
    %358 = vector.load %arg8[%c0_175, %c0_176, %c0_177] : memref<3x4x32xbf16, #tpu.memory_space<vmem>>, vector<1x4x32xbf16>
    %359 = vector.shape_cast %358 : vector<1x4x32xbf16> to vector<4x32xbf16>
    %cst_178 = arith.constant dense<0.000000e+00> : vector<4x32xf32>
    %360 = tpu.matmul %357, %359, %cst_178 {dimension_numbers = #tpu.dot_dimension_numbers<[1], [0], [0], [1], [0, 0, 1, 1], [], []>} : vector<4x4xbf16>, vector<4x32xbf16>, vector<4x32xf32> -> vector<4x32xf32>
    %361 = arith.truncf %351 : vector<4x4xf32> to vector<4x4xbf16>
    %c1_179 = arith.constant 1 : index
    %c0_180 = arith.constant 0 : index
    %c0_181 = arith.constant 0 : index
    %362 = vector.load %arg8[%c1_179, %c0_180, %c0_181] : memref<3x4x32xbf16, #tpu.memory_space<vmem>>, vector<1x4x32xbf16>
    %363 = vector.shape_cast %362 : vector<1x4x32xbf16> to vector<4x32xbf16>
    %cst_182 = arith.constant dense<0.000000e+00> : vector<4x32xf32>
    %364 = tpu.matmul %361, %363, %cst_182 {dimension_numbers = #tpu.dot_dimension_numbers<[1], [0], [0], [1], [0, 0, 1, 1], [], []>} : vector<4x4xbf16>, vector<4x32xbf16>, vector<4x32xf32> -> vector<4x32xf32>
    %365 = arith.addf %360, %364 : vector<4x32xf32>
    %366 = arith.truncf %356 : vector<4x4xf32> to vector<4x4xbf16>
    %c2_183 = arith.constant 2 : index
    %c0_184 = arith.constant 0 : index
    %c0_185 = arith.constant 0 : index
    %367 = vector.load %arg8[%c2_183, %c0_184, %c0_185] : memref<3x4x32xbf16, #tpu.memory_space<vmem>>, vector<1x4x32xbf16>
    %368 = vector.shape_cast %367 : vector<1x4x32xbf16> to vector<4x32xbf16>
    %cst_186 = arith.constant dense<0.000000e+00> : vector<4x32xf32>
    %369 = tpu.matmul %366, %368, %cst_186 {dimension_numbers = #tpu.dot_dimension_numbers<[1], [0], [0], [1], [0, 0, 1, 1], [], []>} : vector<4x4xbf16>, vector<4x32xbf16>, vector<4x32xf32> -> vector<4x32xf32>
    %370 = arith.addf %365, %369 : vector<4x32xf32>
    %c0_187 = arith.constant 0 : index
    %c0_188 = arith.constant 0 : index
    %371 = vector.load %arg9[%c0_187, %c0_188] : memref<1x32xf32, #tpu.memory_space<vmem>>, vector<1x32xf32>
    %372 = vector.broadcast %371 : vector<1x32xf32> to vector<4x32xf32>
    %373 = arith.addf %370, %372 : vector<4x32xf32>
    %cst_189 = arith.constant 0.000000e+00 : f32
    %374 = vector.broadcast %cst_189 : f32 to vector<4x32xf32>
    %375 = arith.maximumf %373, %374 : vector<4x32xf32>
    %376 = arith.truncf %375 : vector<4x32xf32> to vector<4x32xbf16>
    %c0_190 = arith.constant 0 : index
    %c0_191 = arith.constant 0 : index
    %377 = vector.load %arg10[%c0_190, %c0_191] : memref<32x128xbf16, #tpu.memory_space<vmem>>, vector<32x128xbf16>
    %cst_192 = arith.constant dense<0.000000e+00> : vector<4x128xf32>
    %378 = tpu.matmul %376, %377, %cst_192 {dimension_numbers = #tpu.dot_dimension_numbers<[1], [0], [0], [1], [0, 0, 1, 1], [], []>} : vector<4x32xbf16>, vector<32x128xbf16>, vector<4x128xf32> -> vector<4x128xf32>
    %c0_193 = arith.constant 0 : index
    %c0_194 = arith.constant 0 : index
    %379 = vector.load %arg11[%c0_193, %c0_194] : memref<1x128xf32, #tpu.memory_space<vmem>>, vector<1x128xf32>
    %380 = vector.broadcast %379 : vector<1x128xf32> to vector<4x128xf32>
    %381 = arith.addf %378, %380 : vector<4x128xf32>
    %382 = vector.extract_strided_slice %381 {offsets = [0, 0], sizes = [4, 1], strides = [1, 1]} : vector<4x128xf32> to vector<4x1xf32>
    %383 = vector.extract_strided_slice %381 {offsets = [0, 1], sizes = [4, 1], strides = [1, 1]} : vector<4x128xf32> to vector<4x1xf32>
    %384 = vector.extract_strided_slice %381 {offsets = [0, 2], sizes = [4, 1], strides = [1, 1]} : vector<4x128xf32> to vector<4x1xf32>
    %385 = arith.maximumf %382, %383 : vector<4x1xf32>
    %386 = arith.maximumf %385, %384 : vector<4x1xf32>
    %387 = arith.subf %382, %386 : vector<4x1xf32>
    %388 = math.exp %387 : vector<4x1xf32>
    %389 = arith.subf %383, %386 : vector<4x1xf32>
    %390 = math.exp %389 : vector<4x1xf32>
    %391 = arith.subf %384, %386 : vector<4x1xf32>
    %392 = math.exp %391 : vector<4x1xf32>
    %393 = arith.addf %388, %390 : vector<4x1xf32>
    %394 = arith.addf %393, %392 : vector<4x1xf32>
    %395 = tpu.reciprocal %394 {approx = true} : vector<4x1xf32> -> vector<4x1xf32>
    %396 = vector.broadcast %388 : vector<4x1xf32> to vector<4x4xf32>
    %397 = arith.mulf %396, %340 : vector<4x4xf32>
    %398 = vector.broadcast %390 : vector<4x1xf32> to vector<4x4xf32>
    %399 = arith.mulf %398, %351 : vector<4x4xf32>
    %400 = arith.addf %397, %399 : vector<4x4xf32>
    %401 = vector.broadcast %392 : vector<4x1xf32> to vector<4x4xf32>
    %402 = arith.mulf %401, %356 : vector<4x4xf32>
    %403 = arith.addf %400, %402 : vector<4x4xf32>
    %404 = vector.broadcast %395 : vector<4x1xf32> to vector<4x4xf32>
    %405 = arith.mulf %403, %404 : vector<4x4xf32>
    %c0_195 = arith.constant 0 : index
    %c12 = arith.constant 12 : index
    %406 = vector.load %arg12[%c0_195, %c12] : memref<4x16xf32, #tpu.memory_space<vmem>>, vector<4x4xf32>
    tpu.vector_store %arg12[%c0_195, %c12], %405 {strides = array<i32>} : memref<4x16xf32, #tpu.memory_space<vmem>>, vector<4x4xf32>,
    return
  }
  func.func @transform_0(%arg0: i32) -> (i32, i32) {
    %c0_i32 = arith.constant 0 : i32
    %c0_i32_0 = arith.constant 0 : i32
    return %arg0, %c0_i32 : i32, i32
  }
  func.func @transform_1(%arg0: i32) -> (i32, i32, i32) {
    %c0_i32 = arith.constant 0 : i32
    %c0_i32_0 = arith.constant 0 : i32
    %c0_i32_1 = arith.constant 0 : i32
    %c0_i32_2 = arith.constant 0 : i32
    return %c0_i32, %c0_i32_0, %c0_i32_1 : i32, i32, i32
  }
  func.func @transform_2(%arg0: i32) -> (i32, i32, i32) {
    %c0_i32 = arith.constant 0 : i32
    %c0_i32_0 = arith.constant 0 : i32
    %c0_i32_1 = arith.constant 0 : i32
    %c0_i32_2 = arith.constant 0 : i32
    return %c0_i32, %c0_i32_0, %c0_i32_1 : i32, i32, i32
  }
  func.func @transform_3(%arg0: i32) -> (i32, i32, i32) {
    %c0_i32 = arith.constant 0 : i32
    %c0_i32_0 = arith.constant 0 : i32
    %c0_i32_1 = arith.constant 0 : i32
    %c0_i32_2 = arith.constant 0 : i32
    return %c0_i32, %c0_i32_0, %c0_i32_1 : i32, i32, i32
  }
  func.func @transform_4(%arg0: i32) -> (i32, i32, i32) {
    %c0_i32 = arith.constant 0 : i32
    %c0_i32_0 = arith.constant 0 : i32
    %c0_i32_1 = arith.constant 0 : i32
    %c0_i32_2 = arith.constant 0 : i32
    return %c0_i32, %c0_i32_0, %c0_i32_1 : i32, i32, i32
  }
  func.func @transform_5(%arg0: i32) -> (i32, i32, i32) {
    %c0_i32 = arith.constant 0 : i32
    %c0_i32_0 = arith.constant 0 : i32
    %c0_i32_1 = arith.constant 0 : i32
    %c0_i32_2 = arith.constant 0 : i32
    return %c0_i32, %c0_i32_0, %c0_i32_1 : i32, i32, i32
  }
  func.func @transform_6(%arg0: i32) -> (i32, i32, i32) {
    %c0_i32 = arith.constant 0 : i32
    %c0_i32_0 = arith.constant 0 : i32
    %c0_i32_1 = arith.constant 0 : i32
    %c0_i32_2 = arith.constant 0 : i32
    return %c0_i32, %c0_i32_0, %c0_i32_1 : i32, i32, i32
  }
  func.func @transform_7(%arg0: i32) -> (i32, i32, i32) {
    %c0_i32 = arith.constant 0 : i32
    %c0_i32_0 = arith.constant 0 : i32
    %c0_i32_1 = arith.constant 0 : i32
    %c0_i32_2 = arith.constant 0 : i32
    return %c0_i32, %c0_i32_0, %c0_i32_1 : i32, i32, i32
  }
  func.func @transform_8(%arg0: i32) -> (i32, i32) {
    %c0_i32 = arith.constant 0 : i32
    %c0_i32_0 = arith.constant 0 : i32
    %c0_i32_1 = arith.constant 0 : i32
    return %c0_i32, %c0_i32_0 : i32, i32
  }
  func.func @transform_9(%arg0: i32) -> (i32, i32) {
    %c0_i32 = arith.constant 0 : i32
    %c0_i32_0 = arith.constant 0 : i32
    %c0_i32_1 = arith.constant 0 : i32
    return %c0_i32, %c0_i32_0 : i32, i32
  }
  func.func @transform_10(%arg0: i32) -> (i32, i32) {
    %c0_i32 = arith.constant 0 : i32
    %c0_i32_0 = arith.constant 0 : i32
    %c0_i32_1 = arith.constant 0 : i32
    return %c0_i32, %c0_i32_0 : i32, i32
  }
  func.func @transform_11(%arg0: i32) -> (i32, i32) {
    %c0_i32 = arith.constant 0 : i32
    %c0_i32_0 = arith.constant 0 : i32
    return %arg0, %c0_i32 : i32, i32
  }
}

</mosaic_0001>

<bundles_post_ra>
// kernel: tpu_custom_call.1
= control target key start
LH: loop header
LB: loop body
LE: loop exit
PB: predicated region body
PF: predicated region fallthrough
CT: control target
= control target key end

     0   :  { %16 = vsyncpa [#allocation3], 0  ;;  %s3230_s0 = inlined_call_operand.hbm [shape: f32[4,16], index: 0, kind: input, shape index: {}]   ;;  %s3231_s1 = inlined_call_operand.hbm [shape: bf16[3,4,32], index: 1, kind: input, shape index: {}]   ;;  %s3232_s2 = inlined_call_operand.hbm [shape: f32[3,1,32], index: 2, kind: input, shape index: {}]   ;;  %s3233_s3 = inlined_call_operand.vmem [shape: bf16[3,32,32], index: 3, kind: input, shape index: {}]   ;;  %s3234_s4 = inlined_call_operand.hbm [shape: f32[3,1,32], index: 4, kind: input, shape index: {}]   ;;  %s3235_s5 = inlined_call_operand.vmem [shape: bf16[3,32,4], index: 5, kind: input, shape index: {}]   ;;  %s3236_s6 = inlined_call_operand.vmem [shape: f32[3,1,4], index: 6, kind: input, shape index: {}]   ;;  %s3237_s7 = inlined_call_operand.vmem [shape: bf16[3,4,32], index: 7, kind: input, shape index: {}]   ;;  %s3238_s8 = inlined_call_operand.vmem [shape: f32[1,32], index: 8, kind: input, shape index: {}]   ;;  %s3239_s9 = inlined_call_operand.vmem [shape: bf16[32,128], index: 9, kind: input, shape index: {}]   ;;  %s3240_s10 = inlined_call_operand.vmem [shape: f32[1,128], index: 10, kind: input, shape index: {}]   ;;  %s3241_s11 = inlined_call_operand.hbm [shape: f32[4,16], index: 11, kind: output, shape index: {}]  }
   0x1   :  { %17 = vsyncpa [#allocation6], 0 }
   0x2   :  { %18 = vsyncpa [#allocation9], 0 }
   0x3   :  { %19 = vsyncpa [#allocation4], 0  ;;  %s2622_s17 = smov [#allocation5]   ;;  %s2504_s21 = scalar_lea.hbm %s3231_s1, 96 }
   0x4   :  { %s35_s18 = sshll.u32 %s2622_s17, 4  ;;  %p2505_p0 = scmp.ne.s32.totalorder %s3231_s1, %s2504_s21  ;;  %s36_s18 = int_to_ptr.vmem [resolvable:$true] %s35_s18 }
   0x5   :  { %p2508_p1 = scmp.lt.u32.totalorder %s2504_s21, %s3231_s1 }
   0x7   :  { %p2510_p2 = pnand %p2508_p1, %p2505_p0 }
   0x9   :  { %2513 = shalt.err (!%p2510_p2)
}
   0xa   :  { %s2514_s26 = scalar_lea.vmem %s36_s18, 96  ;;  %p2519_p4 = scmp.lt.s32.totalorder %s36_s18, %s36_s18 }
   0xb   :  { %p2515_p3 = scmp.ne.s32.totalorder %s36_s18, %s2514_s26  ;;  %p2520_p5 = scmp.lt.s32.totalorder %s2514_s26, %s2514_s26 }
   0xd   :  { %p2521_p6 = por %p2520_p5, %p2519_p4 }
   0xf   :  { %p2522_p7 = pnand %p2521_p6, %p2515_p3 }
  0x11   :  { %2525 = shalt.err (!%p2522_p7)
}
  0x12   :  { %s2623_s27 = smov 32   ;;  %s2624_s28 = smov 2  }
  0x13   :  { %41 = dma.hbm_to_vmem [thread:$0]  %s3231_s1, 96, %s36_s18, [#allocation6], %s2623_s27, %s2623_s27, %s2624_s28  }
  0x14   :  { %s2625_s12 = smov [#allocation2]   ;;  %s2626_s14 = smov [#allocation7]  }
  0x15   :  { %s26_s13 = sshll.u32 %s2625_s12, 4  ;;  %s47_s15 = sshll.u32 %s2626_s14, 4  ;;  %s27_s13 = int_to_ptr.vmem [resolvable:$true] %s26_s13  ;;  %s48_s15 = int_to_ptr.vmem [resolvable:$true] %s47_s15 }
  0x16   :  { %s2526_s19 = scalar_lea.hbm %s3230_s0, 64 }
  0x17   :  { %p2527_p8 = scmp.ne.s32.totalorder %s3230_s0, %s2526_s19  ;;  %p2530_p9 = scmp.lt.u32.totalorder %s2526_s19, %s3230_s0 }
  0x19   :  { %p2532_p10 = pnand %p2530_p9, %p2527_p8 }
  0x1b   :  { %2535 = shalt.err (!%p2532_p10)
}
  0x1c   :  { %s2536_s1 = scalar_lea.vmem %s27_s13, 64  ;;  %p2541_p12 = scmp.lt.s32.totalorder %s27_s13, %s27_s13 }
  0x1d   :  { %p2537_p11 = scmp.ne.s32.totalorder %s27_s13, %s2536_s1  ;;  %p2542_p13 = scmp.lt.s32.totalorder %s2536_s1, %s2536_s1 }
  0x1f   :  { %p2543_p0 = por %p2542_p13, %p2541_p12 }
  0x21   :  { %p2544_p1 = pnand %p2543_p0, %p2537_p11 }
  0x23   :  { %2547 = shalt.err (!%p2544_p1)
}
  0x24   :  { %29 = dma.hbm_to_vmem [thread:$0]  %s3230_s0, 64, %s27_s13, [#allocation3]  }
  0x25   :  { %s2548_s27 = scalar_lea.hbm %s3232_s2, 48 }
  0x26   :  { %p2549_p2 = scmp.ne.s32.totalorder %s3232_s2, %s2548_s27  ;;  %p2552_p3 = scmp.lt.u32.totalorder %s2548_s27, %s3232_s2 }
  0x28   :  { %p2554_p4 = pnand %p2552_p3, %p2549_p2 }
  0x2a   :  { %2557 = shalt.err (!%p2554_p4)
}
  0x2b   :  { %s2558_s16 = scalar_lea.vmem %s48_s15, 48  ;;  %s2562_s17 = scalar_lea.vmem %s48_s15, 64 }
  0x2c   :  { %p2559_p5 = scmp.ne.s32.totalorder %s48_s15, %s2558_s16  ;;  %p2563_p6 = scmp.lt.s32.totalorder %s48_s15, %s48_s15 }
  0x2d   :  { %p2564_p7 = scmp.lt.s32.totalorder %s2562_s17, %s2558_s16 }
  0x2f   :  { %p2565_p8 = por %p2564_p7, %p2563_p6 }
  0x31   :  { %p2566_p9 = pnand %p2565_p8, %p2559_p5 }
  0x33   :  { %2569 = shalt.err (!%p2566_p9)
}
  0x34   :  { %s2627_s0 = smov 16   ;;  %s2628_s13 = smov 1  }
  0x35   :  { %53 = dma.hbm_to_vmem [thread:$0]  %s3232_s2, 48, %s48_s15, [#allocation6], %s2627_s0, %s2627_s0, %s2628_s13  }
  0x36   :  { %s2629_s21 = smov [#allocation8]   ;;  %s2570_s18 = scalar_lea.hbm %s3234_s4, 48 }
  0x37   :  { %s61_s22 = sshll.u32 %s2629_s21, 4  ;;  %p2571_p10 = scmp.ne.s32.totalorder %s3234_s4, %s2570_s18  ;;  %s62_s22 = int_to_ptr.vmem [resolvable:$true] %s61_s22 }
  0x38   :  { %p2574_p11 = scmp.lt.u32.totalorder %s2570_s18, %s3234_s4 }
  0x3a   :  { %p2576_p12 = pnand %p2574_p11, %p2571_p10 }
  0x3c   :  { %2579 = shalt.err (!%p2576_p12)
}
  0x3d   :  { %s2580_s29 = scalar_lea.vmem %s62_s22, 48  ;;  %s2584_s2 = scalar_lea.vmem %s62_s22, 64 }
  0x3e   :  { %p2581_p13 = scmp.ne.s32.totalorder %s62_s22, %s2580_s29  ;;  %p2585_p0 = scmp.lt.s32.totalorder %s62_s22, %s62_s22 }
  0x3f   :  { %p2586_p1 = scmp.lt.s32.totalorder %s2584_s2, %s2580_s29 }
  0x41   :  { %p2587_p2 = por %p2586_p1, %p2585_p0 }
  0x43   :  { %p2588_p3 = pnand %p2587_p2, %p2581_p13 }
  0x45   :  { %2591 = shalt.err (!%p2588_p3)
}
  0x46   :  { %67 = dma.hbm_to_vmem [thread:$0]  %s3234_s4, 48, %s62_s22, [#allocation9], %s2627_s0, %s2627_s0, %s2628_s13  }
  0x47   :  { %2614 = dma.done.wait [#allocation3], 64  }
  0x48   :  { %2615 = vsyncadd [#allocation3], 4294967232 }
  0x49   :  { %2616 = dma.done.wait [#allocation6], 144  }
  0x4a   :  { %2617 = vsyncadd [#allocation6], 4294967152 }
  0x4b   :  { %2618 = dma.done.wait [#allocation9], 48  }
  0x4c   :  { %2619 = vsyncadd [#allocation9], 4294967248  ;;  %v2630_v0 = vmov 0.0   ;;  %vm2631_vm0 = vmmov 0   ;;  %vm109_vm1 = vcmask 1041408   ;;  %vm105_vm2 = vcmask 31744  }
  0x4d   :  { %2224 = vmatprep.subr.bf16.mxu0 %v2630_v0  ;;  %2226 = vmatprep.mubr.msk.bf16.mxu0 %vm2631_vm0, %v2630_v0  ;;  %v96_v1 = vld [vmem:[#allocation5 + $0x2] sm:$0x3]  ;;  %v2761_v2 = vld [vmem:[#allocation2] sm:$0xf]  ;;  %v2452_v5 = vld [vmem:[%s3233_s3 + $0x10] sm:$0xff]   ;;  %s2632_s14 = smov 120  }
  0x4e   :  { %2230 = vmatprep.subr.bf16.mxu1 %v2630_v0  ;;  %2234 = vmatprep.mubr.msk.bf16.mxu1 %vm2631_vm0, %v2630_v0  ;;  %v111_v3 = vsel %vm109_vm1, %v96_v1, 0  ;;  %v2766_v4 = vpack.c.bf16 %v2761_v2, %v2761_v2  ;;  %v2453_v6 = vld [vmem:[%s3233_s3 + $0x18] sm:$0xff]   ;;  %v2454_v7 = vld [vmem:[%s3235_s5 + $0x10] sm:$0xff]   ;;  %v2065_v8 = vld [vmem:[#allocation7 + $0x1] ss:$0 sm:$0xff]  ;;  %vm180_vm3 = vcmask 261120  }
  0x4f   :  { %628 = vrot.lane.b32.xlu1 %v2761_v2, %s2632_s14  ;;  %2225 = vmatpush3.bf16.msra.mxu0 %v111_v3  ;;  %v2455_v17 = vld [vmem:[%s3235_s5 + $0x18] sm:$0xff]   ;;  %v624_v18 = vrot.slane %v2761_v2, 4  ;;  %s2633_s22 = smov 116   ;;  %s2634_s23 = smov 124   ;;  %v2071_v19 = vld [vmem:[#allocation8 + $0x1] ss:$0 sm:$0xff] }
  0x50   :  { %295 = vrot.lane.b32.xlu0 %v2766_v4, %s2632_s14  ;;  %2231 = vmatpush3.bf16.msra.mxu1 %v2452_v5  ;;  %v431_v31 = vld [vmem:[#allocation5 + $0x4] sm:$0x3]  ;;  %v2456_v46 = vld [vmem:[%s3233_s3 + $0x20] sm:$0xff]   ;;  %v2087_v48 = vld [vmem:[#allocation7 + $0x2] ss:$0 sm:$0xff]  ;;  %vm634_vm4 = vcmask 1043456  }
  0x51   :  { %2232 = vmatprep.subr.bf16.mxu1 %v2630_v0  ;;  %2238 = vmatprep.subr.bf16.mxu0 %v2630_v0  ;;  %v441_v35 = vsel %vm109_vm1, %v431_v31, 0  ;;  %v2457_v50 = vld [vmem:[%s3233_s3 + $0x28] sm:$0xff]   ;;  %v638_v55 = vld [vmem:[#allocation5] sm:$0x3]  ;;  %vm859_vm5 = vcmask 1042432   ;;  %vm852_vm7 = vcmask 1040384  }
  0x52   :  { %2227 = vmatmul.mubr.msk.bf16.vlgmr.msra.gmra.mrb[0].mxu0 %vm105_vm2, %v2766_v4  ;;  %v650_v59 = vsel %vm109_vm1, %v638_v55, 0  ;;  %v2460_v31 = vld [vmem:[%s3233_s3] sm:$0xff]   ;;  %s2635_s14 = smov 127   ;;  %s2636_s16 = smov 126   ;;  %vm1158_vm9 = vcmask 27648   ;;  %vm1454_vm10 = vcmask 60448  }
  0x53   :  { %2242 = vmatprep.mubr.msk.bf16.mxu0 %vm2631_vm0, %v2630_v0  ;;  %2239 = vmatpush3.bf16.msra.mxu0 %v2454_v7  ;;  %v2462_v55 = vld [vmem:[%s3235_s5] sm:$0xff]   ;;  %vm1746_vm11 = vcmask 93248   ;;  %s2643_s19 = smov [#allocation10]   ;;  %vm2046_vm12 = vcmask 126048  }
  0x54   :  { %2233 = vmatpush3.bf16.msra.mxu1 %v2453_v6  ;;  %2240 = vmatprep.subr.bf16.mxu0 %v2630_v0  ;;  %s2054_s20 = sshll.u32 %s2643_s19, 4  ;;  %s2055_s20 = int_to_ptr.vmem [resolvable:$true] %s2054_s20 }
  0x55   :  { %2246 = vmatprep.subr.bf16.mxu1 %v2630_v0  ;;  %631 = vrot.lane.b32.xlu1 %v624_v18, %s2633_s22  ;;  %s2592_s21 = scalar_lea.vmem %s2055_s20, 64  ;;  %p2597_p5 = scmp.lt.s32.totalorder %s2055_s20, %s2055_s20 }
  0x56   :  { %625 = vrot.lane.b32.xlu0 %v624_v18, %s2634_s23  ;;  %p2593_p4 = scmp.ne.s32.totalorder %s2055_s20, %s2592_s21  ;;  %p2598_p6 = scmp.lt.s32.totalorder %s2592_s21, %s2592_s21 }
  0x57   :  { %2241 = vmatpush3.bf16.msra.mxu0 %v2455_v17 }
  0x58   :  { %2252 = vmatprep.subr.bf16.mxu0 %v2630_v0  ;;  %p2599_p7 = por %p2598_p6, %p2597_p5 }
  0x5a   :  { %p2600_p8 = pnand %p2599_p7, %p2593_p4 }
  0xc1   :  { %v629_v53 = vpop.permute.xlu1 %628 }
  0xc2   :  { %v296_v16 = vpop.permute.xlu0 %295 }
  0xc7   :  { %v632_v60 = vpop.permute.xlu1 %631 }
  0xc8   :  { %v626_v61 = vpop.permute.xlu0 %625  ;;  %v636_v62 = vsel %vm634_vm4, %v629_v53, %v632_v60  ;;  %v2119_v53 = vld [vmem:[%s3237_s7 + $0x4] sm:$0x3] }
  0xc9   :  { %v635_v63 = vsel %vm634_vm4, %v2761_v2, %v626_v61  ;;  %v833_v2 = vlaneseq }
  0xca   :  { %v637_v1 = vpack.c.bf16 %v636_v62, %v635_v63 }
 0x125   :  { %v147_v9 = vpop.f32.mrb[0].mxu0 }
 0x126   :  { %v148_v10 = vadd.f32 %v2065_v8, %v147_v9  ;;  %v2228_v11 = vpop.f32.mrb[1].mxu0 }
 0x127   :  { %v150_v12 = vpop.f32.mrb[2].mxu0 }
 0x128   :  { %v153_v13 = vmax.f32 %v148_v10, 0.0  ;;  %v2229_v14 = vpop.f32.mrb[3].mxu0 }
 0x12a   :  { %v154_v15 = vpack.c.bf16 %v153_v13, %v153_v13 }
 0x12c   :  { %2235 = vmatmul.mubr.msk.bf16.vlgmr.msra.gmra.mrb[0].mxu1 %vm180_vm3, %v154_v15 }
 0x12d   :  { %2247 = vmatpush3.bf16.msra.mxu1 %v111_v3  ;;  %2248 = vmatprep.mubr.msk.bf16.mxu1 %vm2631_vm0, %v2630_v0  ;;  %v2458_v3 = vld [vmem:[%s3235_s5 + $0x20] sm:$0xff]  }
 0x12e   :  { %2260 = vmatprep.subr.bf16.mxu1 %v2630_v0 }
 0x134   :  { %2249 = vmatmul.mubr.msk.bf16.vlgmr.msra.gmra.mrb[4].mxu1 %vm105_vm2, %v296_v16 }
 0x135   :  { %2261 = vmatpush3.bf16.msra.mxu1 %v2454_v7  ;;  %2264 = vmatprep.mubr.msk.bf16.mxu1 %vm2631_vm0, %v2630_v0 }
 0x136   :  { %2262 = vmatprep.subr.bf16.mxu1 %v2630_v0 }
 0x139   :  { %2263 = vmatpush3.bf16.msra.mxu1 %v2455_v17 }
 0x13a   :  { %2274 = vmatprep.subr.bf16.mxu1 %v2630_v0 }
 0x1ff   :  { %v218_v20 = vpop.f32.mrb[0].mxu1 }
 0x200   :  { %v219_v21 = vadd.f32 %v2071_v19, %v218_v20  ;;  %v2236_v22 = vpop.f32.mrb[1].mxu1 }
 0x201   :  { %v221_v23 = vpop.f32.mrb[2].mxu1 }
 0x202   :  { %v224_v24 = vmax.f32 %v219_v21, 0.0  ;;  %v2237_v25 = vpop.f32.mrb[3].mxu1  ;;  %v2093_v23 = vld [vmem:[#allocation8 + $0x2] ss:$0 sm:$0xff] }
 0x204   :  { %v225_v26 = vpack.c.bf16 %v224_v24, %v224_v24 }
 0x206   :  { %2243 = vmatmul.mubr.msk.bf16.vlgmr.msra.gmra.mrb[4].mxu0 %vm180_vm3, %v225_v26 }
 0x207   :  { %2253 = vmatpush3.bf16.msra.mxu0 %v2452_v5  ;;  %v334_v27 = vpop.f32.mrb[4].mxu1  ;;  %2256 = vmatprep.mubr.msk.bf16.mxu0 %vm2631_vm0, %v2630_v0  ;;  %v2080_v5 = vld [vmem:[%s3236_s6 + $0x1] ss:$0 sm:$0xff] }
 0x208   :  { %v335_v28 = vadd.f32 %v2065_v8, %v334_v27  ;;  %v2250_v29 = vpop.f32.mrb[5].mxu1  ;;  %2254 = vmatprep.subr.bf16.mxu0 %v2630_v0 }
 0x209   :  { %v337_v30 = vpop.f32.mrb[6].mxu1 }
 0x20a   :  { %v340_v32 = vmax.f32 %v335_v28, 0.0  ;;  %v2251_v33 = vpop.f32.mrb[7].mxu1 }
 0x20b   :  { %2255 = vmatpush3.bf16.msra.mxu0 %v2453_v6  ;;  %v834_v6 = vshrl.u32 %v833_v2, 7 }
 0x20c   :  { %v341_v34 = vpack.c.bf16 %v340_v32, %v340_v32  ;;  %2268 = vmatprep.subr.bf16.mxu0 %v2630_v0 }
 0x20d   :  { %v839_v8 = vand.u32 1, %v834_v6 }
 0x20e   :  { %2257 = vmatmul.mubr.msk.bf16.vlgmr.msra.gmra.mrb[8].mxu0 %vm180_vm3, %v341_v34  ;;  %v2106_v34 = vld [vmem:[#allocation7] ss:$0 sm:$0xff] }
 0x20f   :  { %2269 = vmatpush3.bf16.msra.mxu0 %v441_v35  ;;  %2270 = vmatprep.mubr.msk.bf16.mxu0 %vm2631_vm0, %v2630_v0  ;;  %vm2849_vm6 = vcmp.eq.s32.totalorder %v839_v8, 1  ;;  %vm2874_vm8 = vcmp.eq.s32.totalorder %v839_v8, 0 }
 0x210   :  { %2282 = vmatprep.subr.bf16.mxu0 %v2630_v0 }
 0x216   :  { %2271 = vmatmul.mubr.msk.bf16.vlgmr.msra.gmra.mrb[12].mxu0 %vm105_vm2, %v2766_v4  ;;  %v2459_v4 = vld [vmem:[%s3235_s5 + $0x28] sm:$0xff]  }
 0x217   :  { %2286 = vmatprep.mubr.msk.bf16.mxu0 %vm2631_vm0, %v2630_v0  ;;  %2283 = vmatpush3.bf16.msra.mxu0 %v2458_v3 }
 0x218   :  { %2284 = vmatprep.subr.bf16.mxu0 %v2630_v0 }
 0x21b   :  { %2285 = vmatpush3.bf16.msra.mxu0 %v2459_v4 }
 0x21c   :  { %2296 = vmatprep.subr.bf16.mxu0 %v2630_v0 }
 0x2d9   :  { %v288_v36 = vpop.f32.mrb[4].mxu0 }
 0x2da   :  { %v2244_v37 = vpop.f32.mrb[5].mxu0  ;;  %v2846_v7 = vadd.f32 %v2080_v5, %v288_v36  ;;  %v2461_v36 = vld [vmem:[%s3233_s3 + $0x8] sm:$0xff]  }
 0x2db   :  { %v291_v38 = vpop.f32.mrb[6].mxu0 }
 0x2dc   :  { %v2245_v39 = vpop.f32.mrb[7].mxu0  ;;  %v1749_v9 = vrot.slane %v2846_v7, 1  ;;  %v870_v16 = vmul.f32 0.75, %v2846_v7 }
 0x2de   :  { %v1751_v14 = vsel %vm859_vm5, %v1749_v9, %v2846_v7 }
 0x2e1   :  { %v379_v40 = vpop.f32.mrb[8].mxu0 }
 0x2e2   :  { %v380_v41 = vadd.f32 %v2071_v19, %v379_v40  ;;  %v2258_v42 = vpop.f32.mrb[9].mxu0 }
 0x2e3   :  { %v382_v43 = vpop.f32.mrb[10].mxu0 }
 0x2e4   :  { %v385_v44 = vmax.f32 %v380_v41, 0.0  ;;  %v2259_v45 = vpop.f32.mrb[11].mxu0 }
 0x2e5   :  { %v2116_v45 = vld [vmem:[%s3237_s7 + $0x2] sm:$0x3] }
 0x2e6   :  { %v386_v47 = vpack.c.bf16 %v385_v44, %v385_v44 }
 0x2e8   :  { %2265 = vmatmul.mubr.msk.bf16.vlgmr.msra.gmra.mrb[8].mxu1 %vm180_vm3, %v386_v47 }
 0x2e9   :  { %2275 = vmatpush3.bf16.msra.mxu1 %v2456_v46  ;;  %v477_v49 = vpop.f32.mrb[12].mxu0  ;;  %2278 = vmatprep.mubr.msk.bf16.mxu1 %vm2631_vm0, %v2630_v0 }
 0x2ea   :  { %v478_v51 = vadd.f32 %v2087_v48, %v477_v49  ;;  %v2272_v52 = vpop.f32.mrb[13].mxu0  ;;  %2276 = vmatprep.subr.bf16.mxu1 %v2630_v0 }
 0x2eb   :  { %v480_v54 = vpop.f32.mrb[14].mxu0 }
 0x2ec   :  { %v483_v56 = vmax.f32 %v478_v51, 0.0  ;;  %v2273_v57 = vpop.f32.mrb[15].mxu0  ;;  %v979_v54 = vsel %vm109_vm1, %v2119_v53, 0 }
 0x2ed   :  { %2277 = vmatpush3.bf16.msra.mxu1 %v2457_v50  ;;  %v884_v50 = vsel %vm109_vm1, %v2116_v45, 0  ;;  %v2102_v57 = vld [vmem:[%s3236_s6 + $0x2] ss:$0 sm:$0xff]  ;;  %v2139_v45 = vld [vmem:[%s3237_s7 + $0x4] sm:$0x3] }
 0x2ee   :  { %v484_v58 = vpack.c.bf16 %v483_v56, %v483_v56  ;;  %2290 = vmatprep.subr.bf16.mxu1 %v2630_v0  ;;  %v2463_v56 = vld [vmem:[%s3235_s5 + $0x8] sm:$0xff]  }
 0x2f0   :  { %2279 = vmatmul.mubr.msk.bf16.vlgmr.msra.gmra.mrb[12].mxu1 %vm180_vm3, %v484_v58 }
 0x2f1   :  { %2291 = vmatpush3.bf16.msra.mxu1 %v650_v59  ;;  %2292 = vmatprep.mubr.msk.bf16.mxu1 %vm2631_vm0, %v2630_v0 }
 0x2f2   :  { %2304 = vmatprep.subr.bf16.mxu1 %v2630_v0 }
 0x2f8   :  { %2293 = vmatmul.mubr.msk.bf16.vlgmr.msra.gmra.mrb[16].mxu1 %vm105_vm2, %v637_v1 }
 0x2f9   :  { %2308 = vmatprep.mubr.msk.bf16.mxu1 %vm2631_vm0, %v2630_v0  ;;  %2305 = vmatpush3.bf16.msra.mxu1 %v2462_v55 }
 0x2fa   :  { %2306 = vmatprep.subr.bf16.mxu1 %v2630_v0 }
 0x2fd   :  { %2307 = vmatpush3.bf16.msra.mxu1 %v2463_v56 }
 0x2fe   :  { %2318 = vmatprep.subr.bf16.mxu1 %v2630_v0 }
 0x3bb   :  { %v424_v10 = vpop.f32.mrb[8].mxu1 }
 0x3bc   :  { %v425_v12 = vadd.f32 %v2080_v5, %v424_v10  ;;  %v2266_v13 = vpop.f32.mrb[9].mxu1 }
 0x3bd   :  { %v427_v15 = vpop.f32.mrb[10].mxu1  ;;  %v2108_v13 = vld [vmem:[#allocation8] ss:$0 sm:$0xff] }
 0x3be   :  { %v1160_v17 = vmul.f32 0.25, %v425_v12  ;;  %v2856_v18 = vmul.f32 0.75, %v425_v12  ;;  %v1752_v19 = vsel %vm2849_vm6, %v425_v12, %v1751_v14  ;;  %v2267_v20 = vpop.f32.mrb[11].mxu1  ;;  %v865_v32 = vrot.slane %v425_v12, 7  ;;  %v2126_v14 = vld [vmem:[%s3237_s7 + $0x2] sm:$0x3] }
 0x3bf   :  { %v1753_v21 = vmul.f32 0.25, %v1752_v19 }
 0x3c0   :  { %v2860_v22 = vadd.f32 %v1160_v17, %v870_v16  ;;  %v867_v38 = vsel %vm852_vm7, %v425_v12, %v865_v32 }
 0x3c1   :  { %v2863_v24 = vadd.f32 %v1753_v21, %v2856_v18  ;;  %v868_v44 = vsel %vm2874_vm8, %v2846_v7, %v867_v38 }
 0x3c2   :  { %v869_v48 = vmul.f32 0.25, %v868_v44 }
 0x3c3   :  { %v547_v25 = vpop.f32.mrb[12].mxu1 }
 0x3c4   :  { %v548_v26 = vadd.f32 %v2093_v23, %v547_v25  ;;  %v2280_v27 = vpop.f32.mrb[13].mxu1  ;;  %v2891_v51 = vadd.f32 %v870_v16, %v869_v48  ;;  %v1172_v23 = vsel %vm109_vm1, %v2126_v14, 0 }
 0x3c5   :  { %v550_v28 = vpop.f32.mrb[14].mxu1 }
 0x3c6   :  { %v553_v29 = vmax.f32 %v548_v26, 0.0  ;;  %v2281_v30 = vpop.f32.mrb[15].mxu1  ;;  %v877_v52 = vpack.c.bf16 %v2891_v51, %v2891_v51 }
 0x3c7   :  { %v2129_v30 = vld [vmem:[%s3237_s7 + $0x4] sm:$0x3] }
 0x3c8   :  { %v554_v33 = vpack.c.bf16 %v553_v29, %v553_v29 }
 0x3ca   :  { %2287 = vmatmul.mubr.msk.bf16.vlgmr.msra.gmra.mrb[16].mxu0 %vm180_vm3, %v554_v33 }
 0x3cb   :  { %v686_v35 = vpop.f32.mrb[16].mxu1  ;;  %2297 = vmatpush3.bf16.msra.mxu0 %v2460_v31  ;;  %2300 = vmatprep.mubr.msk.bf16.mxu0 %vm2631_vm0, %v2630_v0 }
 0x3cc   :  { %v687_v39 = vadd.f32 %v2106_v34, %v686_v35  ;;  %v2294_v40 = vpop.f32.mrb[17].mxu1  ;;  %2298 = vmatprep.subr.bf16.mxu0 %v2630_v0  ;;  %v1268_v35 = vsel %vm109_vm1, %v2129_v30, 0 }
 0x3cd   :  { %v689_v41 = vpop.f32.mrb[18].mxu1  ;;  %v2136_v40 = vld [vmem:[%s3237_s7 + $0x2] sm:$0x3] }
 0x3ce   :  { %v690_v42 = vadd.f32 %v2106_v34, %v689_v41  ;;  %v2295_v43 = vpop.f32.mrb[19].mxu1  ;;  %v693_v46 = vmax.f32 %v687_v39, 0.0  ;;  %v1166_v34 = vpack.c.bf16 %v2860_v22, %v2860_v22 }
 0x3cf   :  { %2299 = vmatpush3.bf16.msra.mxu0 %v2461_v36  ;;  %v1456_v43 = vmul.f32 0.25, %v2846_v7  ;;  %v1563_v7 = vsel %vm109_vm1, %v2139_v45, 0 }
 0x3d0   :  { %v694_v47 = vmax.f32 %v690_v42, 0.0  ;;  %2312 = vmatprep.subr.bf16.mxu0 %v2630_v0  ;;  %v1469_v42 = vsel %vm109_vm1, %v2136_v40, 0 }
 0x3d1   :  { %v2965_v44 = vadd.f32 %v2856_v18, %v1456_v43  ;;  %v2146_v18 = vld [vmem:[%s3237_s7 + $0x2] sm:$0x3]  ;;  %v3039_v43 = vld [vmem:[%s3238_s8] ss:$0 sm:$0xff] }
 0x3d2   :  { %v695_v49 = vpack.c.bf16 %v694_v47, %v693_v46  ;;  %v1764_v48 = vsel %vm109_vm1, %v2146_v18, 0 }
 0x3d3   :  { %v1463_v46 = vpack.c.bf16 %v2965_v44, %v2965_v44 }
 0x3d4   :  { %2301 = vmatmul.mubr.msk.bf16.vlgmr.msra.gmra.mrb[20].mxu0 %vm180_vm3, %v695_v49  ;;  %v2149_v49 = vld [vmem:[%s3237_s7 + $0x4] sm:$0x3] }
 0x3d5   :  { %2313 = vmatpush3.bf16.msra.mxu0 %v884_v50  ;;  %2314 = vmatprep.mubr.msk.bf16.mxu0 %vm2631_vm0, %v2630_v0  ;;  %v1758_v50 = vpack.c.bf16 %v2863_v24, %v2863_v24 }
 0x3d6   :  { %2324 = vmatprep.subr.bf16.mxu0 %v2630_v0 }
 0x3dc   :  { %2315 = vmatmul.mubr.msk.bf16.vlgmr.msra.gmra.mrb[24].mxu0 %vm105_vm2, %v877_v52  ;;  %v1860_v52 = vsel %vm109_vm1, %v2149_v49, 0 }
 0x3dd   :  { %2326 = vmatprep.mubr.msk.bf16.mxu0 %vm2631_vm0, %v2630_v0  ;;  %2325 = vmatpush3.bf16.msra.mxu0 %v979_v54  ;;  %v876_v54 = vld [vmem:[%s3237_s7] sm:$0x3] }
 0x3de   :  { %2338 = vmatprep.subr.bf16.mxu0 %v2630_v0  ;;  %v930_v55 = vsel %vm109_vm1, %v876_v54, 0 }
 0x49d   :  { %v617_v58 = vpop.f32.mrb[16].mxu0 }
 0x49e   :  { %v618_v59 = vadd.f32 %v2102_v57, %v617_v58  ;;  %v2288_v60 = vpop.f32.mrb[17].mxu0 }
 0x49f   :  { %v620_v61 = vpop.f32.mrb[18].mxu0  ;;  %v2112_v60 = vld [vmem:[%s3236_s6] ss:$0 sm:$0xff] }
 0x4a0   :  { %v2289_v62 = vpop.f32.mrb[19].mxu0  ;;  %v850_v63 = vrot.slane %v618_v59, 7  ;;  %v857_v1 = vrot.slane %v618_v59, 1  ;;  %v873_v5 = vmul.f32 0.625, %v618_v59  ;;  %v1163_v9 = vmul.f32 0.875, %v618_v59 }
 0x4a2   :  { %v853_v3 = vsel %vm852_vm7, %v618_v59, %v850_v63  ;;  %v860_v4 = vsel %vm859_vm5, %v857_v1, %v618_v59 }
 0x4a3   :  { %v856_v2 = vsel %vm2874_vm8, %v618_v59, %v853_v3  ;;  %v863_v6 = vsel %vm2849_vm6, %v618_v59, %v860_v4 }
 0x4a4   :  { %v872_v8 = vmul.f32 0.375, %v856_v2  ;;  %v1459_v10 = vmul.f32 0.125, %v863_v6  ;;  %v1755_v12 = vmul.f32 0.375, %v863_v6  ;;  %v1162_v36 = vmul.f32 0.125, %v856_v2 }
 0x4a6   :  { %v2924_v15 = vadd.f32 %v873_v5, %v872_v8  ;;  %v2926_v16 = vadd.f32 %v1459_v10, %v1163_v9  ;;  %v2928_v17 = vadd.f32 %v1755_v12, %v873_v5  ;;  %v2951_v39 = vadd.f32 %v1163_v9, %v1162_v36 }
 0x4a7   :  { %v756_v19 = vpop.f32.mrb[20].mxu0 }
 0x4a8   :  { %v757_v20 = vadd.f32 %v2108_v13, %v756_v19  ;;  %v2302_v21 = vpop.f32.mrb[21].mxu0  ;;  %v972_v11 = vpack.c.bf16 %v2924_v15, %v2924_v15  ;;  %v1262_v41 = vpack.c.bf16 %v2951_v39, %v2951_v39  ;;  %v1557_v47 = vpack.c.bf16 %v2926_v16, %v2926_v16 }
 0x4a9   :  { %v759_v25 = vpop.f32.mrb[22].mxu0  ;;  %v1854_v53 = vpack.c.bf16 %v2928_v17, %v2928_v17 }
 0x4aa   :  { %v760_v26 = vadd.f32 %v2108_v13, %v759_v25  ;;  %v2303_v27 = vpop.f32.mrb[23].mxu0  ;;  %2327 = vmatmul.mubr.msk.bf16.vlgmr.msra.gmra.mrb[28].mxu0 %vm105_vm2, %v972_v11  ;;  %v763_v28 = vmax.f32 %v757_v20, 0.0 }
 0x4ab   :  { %2339 = vmatpush3.bf16.msra.mxu0 %v1172_v23  ;;  %2340 = vmatprep.mubr.msk.bf16.mxu0 %vm2631_vm0, %v2630_v0 }
 0x4ac   :  { %v764_v29 = vmax.f32 %v760_v26, 0.0  ;;  %2350 = vmatprep.subr.bf16.mxu0 %v2630_v0 }
 0x4ae   :  { %v765_v31 = vpack.c.bf16 %v764_v29, %v763_v28 }
 0x4af   :  { %v2940_v32 = vpop.f32.mrb[24].mxu0 }
 0x4b0   :  { %2309 = vmatmul.mubr.msk.bf16.vlgmr.msra.gmra.mrb[20].mxu1 %vm180_vm3, %v765_v31  ;;  %v2316_v33 = vpop.f32.mrb[25].mxu0 }
 0x4b1   :  { %v923_v37 = vpop.f32.mrb[26].mxu0  ;;  %2320 = vmatprep.mubr.msk.bf16.mxu1 %vm2631_vm0, %v2630_v0  ;;  %2319 = vmatpush3.bf16.msra.mxu1 %v930_v55 }
 0x4b2   :  { %v2317_v38 = vpop.f32.mrb[27].mxu0  ;;  %2341 = vmatmul.mubr.msk.bf16.vlgmr.msra.gmra.mrb[32].mxu0 %vm105_vm2, %v1166_v34  ;;  %2330 = vmatprep.subr.bf16.mxu1 %v2630_v0  ;;  %v2464_v37 = vld [vmem:[%s3239_s9] sm:$0xff]  }
 0x4b3   :  { %2351 = vmatpush3.bf16.msra.mxu0 %v1268_v35  ;;  %2352 = vmatprep.mubr.msk.bf16.mxu0 %vm2631_vm0, %v2630_v0  ;;  %v2465_v38 = vld [vmem:[%s3239_s9 + $0x8] sm:$0xff]  }
 0x4b4   :  { %2364 = vmatprep.subr.bf16.mxu0 %v2630_v0 }
 0x4ba   :  { %2353 = vmatmul.mubr.msk.bf16.vlgmr.msra.gmra.mrb[36].mxu0 %vm105_vm2, %v1262_v41 }
 0x4bb   :  { %2365 = vmatpush3.bf16.msra.mxu0 %v1469_v42  ;;  %2366 = vmatprep.mubr.msk.bf16.mxu0 %vm2631_vm0, %v2630_v0 }
 0x4bc   :  { %2376 = vmatprep.subr.bf16.mxu0 %v2630_v0 }
 0x4c2   :  { %2367 = vmatmul.mubr.msk.bf16.vlgmr.msra.gmra.mrb[40].mxu0 %vm105_vm2, %v1463_v46 }
 0x4c3   :  { %2377 = vmatpush3.bf16.msra.mxu0 %v1563_v7  ;;  %2378 = vmatprep.mubr.msk.bf16.mxu0 %vm2631_vm0, %v2630_v0 }
 0x4c4   :  { %2390 = vmatprep.subr.bf16.mxu0 %v2630_v0 }
 0x4ca   :  { %2379 = vmatmul.mubr.msk.bf16.vlgmr.msra.gmra.mrb[44].mxu0 %vm105_vm2, %v1557_v47  ;;  %v1165_v47 = vld [vmem:[%s3237_s7] sm:$0x3] }
 0x4cb   :  { %2391 = vmatpush3.bf16.msra.mxu0 %v1764_v48  ;;  %2392 = vmatprep.mubr.msk.bf16.mxu0 %vm2631_vm0, %v2630_v0 }
 0x4cc   :  { %2402 = vmatprep.subr.bf16.mxu0 %v2630_v0 }
 0x4d2   :  { %2393 = vmatmul.mubr.msk.bf16.vlgmr.msra.gmra.mrb[48].mxu0 %vm105_vm2, %v1758_v50  ;;  %v1220_v50 = vsel %vm109_vm1, %v1165_v47, 0 }
 0x4d3   :  { %2403 = vmatpush3.bf16.msra.mxu0 %v1860_v52  ;;  %2404 = vmatprep.mubr.msk.bf16.mxu0 %vm2631_vm0, %v2630_v0  ;;  %v2466_v52 = vld [vmem:[%s3239_s9] sm:$0xff]  }
 0x4da   :  { %2405 = vmatmul.mubr.msk.bf16.vlgmr.msra.gmra.mrb[52].mxu0 %vm105_vm2, %v1854_v53  ;;  %v2467_v53 = vld [vmem:[%s3239_s9 + $0x8] sm:$0xff]  }
 0x57d   :  { %v1015_v56 = vpop.f32.mrb[28].mxu0 }
 0x57e   :  { %v2328_v57 = vpop.f32.mrb[29].mxu0 }
 0x57f   :  { %v1018_v58 = vpop.f32.mrb[30].mxu0 }
 0x580   :  { %v2329_v59 = vpop.f32.mrb[31].mxu0 }
 0x583   :  { %v826_v61 = vpop.f32.mrb[20].mxu1 }
 0x584   :  { %v3008_v62 = vadd.f32 %v2112_v60, %v826_v61  ;;  %v2310_v63 = vpop.f32.mrb[21].mxu1 }
 0x585   :  { %v829_v1 = vpop.f32.mrb[22].mxu1  ;;  %v3010_v3 = vpop.f32.mrb[32].mxu0 }
 0x586   :  { %v875_v4 = vpack.c.bf16 %v3008_v62, %v3008_v62  ;;  %v3014_v2 = vadd.f32 %v2112_v60, %v829_v1  ;;  %v2311_v5 = vpop.f32.mrb[23].mxu1  ;;  %v2342_v6 = vpop.f32.mrb[33].mxu0 }
 0x587   :  { %v1211_v8 = vpop.f32.mrb[34].mxu0  ;;  %v1462_v5 = vld [vmem:[%s3237_s7] sm:$0x3] }
 0x588   :  { %2321 = vmatmul.mubr.msk.bf16.vlgmr.msra.gmra.mrb[24].mxu1 %vm105_vm2, %v875_v4  ;;  %v2343_v9 = vpop.f32.mrb[35].mxu0 }
 0x589   :  { %2334 = vmatprep.mubr.msk.bf16.mxu1 %vm2631_vm0, %v2630_v0  ;;  %2331 = vmatpush3.bf16.msra.mxu1 %v2464_v37  ;;  %v1515_v9 = vsel %vm109_vm1, %v1462_v5, 0 }
 0x58a   :  { %2332 = vmatprep.subr.bf16.mxu1 %v2630_v0 }
 0x58d   :  { %v1304_v10 = vpop.f32.mrb[36].mxu0  ;;  %2333 = vmatpush3.bf16.msra.mxu1 %v2465_v38 }
 0x58e   :  { %v2354_v12 = vpop.f32.mrb[37].mxu0  ;;  %2344 = vmatprep.subr.bf16.mxu1 %v2630_v0 }
 0x58f   :  { %v1307_v13 = vpop.f32.mrb[38].mxu0  ;;  %v2469_v12 = vld [vmem:[%s3239_s9 + $0x8] sm:$0xff]  }
 0x590   :  { %v2355_v14 = vpop.f32.mrb[39].mxu0  ;;  %v3089_v13 = vld [vmem:[%s3240_s10] ss:$0 sm:$0xff] }
 0x595   :  { %v3019_v19 = vpop.f32.mrb[40].mxu0 }
 0x596   :  { %v2368_v20 = vpop.f32.mrb[41].mxu0 }
 0x597   :  { %v1508_v21 = vpop.f32.mrb[42].mxu0 }
 0x598   :  { %v2369_v11 = vpop.f32.mrb[43].mxu0 }
 0x59d   :  { %v3021_v23 = vpop.f32.mrb[44].mxu0 }
 0x59e   :  { %v2380_v25 = vpop.f32.mrb[45].mxu0 }
 0x59f   :  { %v1602_v26 = vpop.f32.mrb[46].mxu0 }
 0x5a0   :  { %v2381_v27 = vpop.f32.mrb[47].mxu0 }
 0x5a5   :  { %v3023_v28 = vpop.f32.mrb[48].mxu0 }
 0x5a6   :  { %v2394_v29 = vpop.f32.mrb[49].mxu0 }
 0x5a7   :  { %v1803_v30 = vpop.f32.mrb[50].mxu0 }
 0x5a8   :  { %v2395_v31 = vpop.f32.mrb[51].mxu0 }
 0x5ad   :  { %v3025_v33 = vpop.f32.mrb[52].mxu0 }
 0x5ae   :  { %v2406_v34 = vpop.f32.mrb[53].mxu0 }
 0x5af   :  { %v1899_v35 = vpop.f32.mrb[54].mxu0 }
 0x5b0   :  { %v2407_v36 = vpop.f32.mrb[55].mxu0 }
 0x5b1   :  { %v1757_v36 = vld [vmem:[%s3237_s7] sm:$0x3] }
 0x65b   :  { %v966_v40 = vpop.f32.mrb[24].mxu1 }
 0x65c   :  { %v967_v41 = vadd.f32 %v966_v40, %v2940_v32  ;;  %v2322_v42 = vpop.f32.mrb[25].mxu1  ;;  %v1215_v32 = vrot.slane %v875_v4, 2  ;;  %v1812_v40 = vsel %vm109_vm1, %v1757_v36, 0 }
 0x65d   :  { %v969_v45 = vpop.f32.mrb[26].mxu1 }
 0x65e   :  { %v1021_v46 = vadd.f32 %v1015_v56, %v967_v41  ;;  %v2323_v7 = vpop.f32.mrb[27].mxu1  ;;  %v2471_v41 = vld [vmem:[%s3239_s9 + $0x8] sm:$0xff]  }
 0x660   :  { %v1029_v18 = vadd.f32 %v3039_v43, %v1021_v46 }
 0x662   :  { %v1030_v48 = vmax.f32 %v1029_v18, 0.0 }
 0x664   :  { %v1031_v49 = vpack.c.bf16 %v1030_v48, %v1030_v48 }
 0x666   :  { %2335 = vmatmul.mubr.msk.bf16.vlgmr.msra.gmra.mrb[28].mxu1 %vm180_vm3, %v1031_v49 }
 0x667   :  { %2345 = vmatpush3.bf16.msra.mxu1 %v1220_v50  ;;  %2346 = vmatprep.mubr.msk.bf16.mxu1 %vm2631_vm0, %v2630_v0 }
 0x668   :  { %2356 = vmatprep.subr.bf16.mxu1 %v2630_v0 }
 0x66e   :  { %2347 = vmatmul.mubr.msk.bf16.vlgmr.msra.gmra.mrb[32].mxu1 %vm105_vm2, %v1215_v32 }
 0x66f   :  { %2360 = vmatprep.mubr.msk.bf16.mxu1 %vm2631_vm0, %v2630_v0  ;;  %2357 = vmatpush3.bf16.msra.mxu1 %v2466_v52 }
 0x670   :  { %2358 = vmatprep.subr.bf16.mxu1 %v2630_v0 }
 0x673   :  { %2359 = vmatpush3.bf16.msra.mxu1 %v2467_v53 }
 0x674   :  { %2370 = vmatprep.subr.bf16.mxu1 %v2630_v0 }
 0x739   :  { %v3061_v54 = vpop.f32.mrb[28].mxu1 }
 0x73a   :  { %v2336_v55 = vpop.f32.mrb[29].mxu1 }
 0x73b   :  { %v1095_v56 = vpop.f32.mrb[30].mxu1 }
 0x73c   :  { %v2337_v57 = vpop.f32.mrb[31].mxu1 }
 0x741   :  { %v1256_v58 = vpop.f32.mrb[32].mxu1 }
 0x742   :  { %v1257_v59 = vadd.f32 %v1256_v58, %v3010_v3  ;;  %v2348_v60 = vpop.f32.mrb[33].mxu1  ;;  %v1461_v3 = vpack.c.bf16 %v3014_v2, %v3014_v2 }
 0x743   :  { %v1259_v61 = vpop.f32.mrb[34].mxu1 }
 0x744   :  { %v1310_v63 = vadd.f32 %v1304_v10, %v1257_v59  ;;  %v2349_v1 = vpop.f32.mrb[35].mxu1  ;;  %v2468_v10 = vld [vmem:[%s3239_s9] sm:$0xff]  }
 0x746   :  { %v1318_v4 = vadd.f32 %v3039_v43, %v1310_v63 }
 0x748   :  { %v1319_v6 = vmax.f32 %v1318_v4, 0.0 }
 0x74a   :  { %v1320_v8 = vpack.c.bf16 %v1319_v6, %v1319_v6 }
 0x74c   :  { %2361 = vmatmul.mubr.msk.bf16.vlgmr.msra.gmra.mrb[36].mxu1 %vm180_vm3, %v1320_v8 }
 0x74d   :  { %2371 = vmatpush3.bf16.msra.mxu1 %v1515_v9  ;;  %2372 = vmatprep.mubr.msk.bf16.mxu1 %vm2631_vm0, %v2630_v0 }
 0x74e   :  { %2382 = vmatprep.subr.bf16.mxu1 %v2630_v0 }
 0x754   :  { %2373 = vmatmul.mubr.msk.bf16.vlgmr.msra.gmra.mrb[40].mxu1 %vm105_vm2, %v1461_v3 }
 0x755   :  { %2386 = vmatprep.mubr.msk.bf16.mxu1 %vm2631_vm0, %v2630_v0  ;;  %2383 = vmatpush3.bf16.msra.mxu1 %v2468_v10 }
 0x756   :  { %2384 = vmatprep.subr.bf16.mxu1 %v2630_v0 }
 0x759   :  { %2385 = vmatpush3.bf16.msra.mxu1 %v2469_v12 }
 0x75a   :  { %2396 = vmatprep.subr.bf16.mxu1 %v2630_v0 }
 0x81f   :  { %v1381_v14 = vpop.f32.mrb[36].mxu1 }
 0x820   :  { %v3092_v20 = vadd.f32 %v3089_v13, %v1381_v14  ;;  %v2362_v21 = vpop.f32.mrb[37].mxu1 }
 0x821   :  { %v1384_v11 = vpop.f32.mrb[38].mxu1 }
 0x822   :  { %1388 = vrot.lane.b32.xlu0 %v3092_v20, %s2635_s14  ;;  %v2363_v25 = vpop.f32.mrb[39].mxu1 }
 0x826   :  { %1392 = vrot.lane.b32.xlu0 %v3092_v20, %s2636_s16 }
 0x827   :  { %v1551_v26 = vpop.f32.mrb[40].mxu1 }
 0x828   :  { %v1552_v27 = vadd.f32 %v1551_v26, %v3019_v19  ;;  %v2374_v29 = vpop.f32.mrb[41].mxu1  ;;  %v1807_v19 = vrot.slane %v1461_v3, 2 }
 0x829   :  { %v1554_v30 = vpop.f32.mrb[42].mxu1 }
 0x82a   :  { %v1605_v31 = vadd.f32 %v3021_v23, %v1552_v27  ;;  %v2375_v34 = vpop.f32.mrb[43].mxu1  ;;  %v2470_v23 = vld [vmem:[%s3239_s9] sm:$0xff]   ;;  %s2640_s9 = smov 4  }
 0x82c   :  { %v1613_v35 = vadd.f32 %v3039_v43, %v1605_v31 }
 0x82e   :  { %v1614_v37 = vmax.f32 %v1613_v35, 0.0 }
 0x830   :  { %v1615_v38 = vpack.c.bf16 %v1614_v37, %v1614_v37 }
 0x832   :  { %2387 = vmatmul.mubr.msk.bf16.vlgmr.msra.gmra.mrb[44].mxu1 %vm180_vm3, %v1615_v38 }
 0x833   :  { %2397 = vmatpush3.bf16.msra.mxu1 %v1812_v40  ;;  %2398 = vmatprep.mubr.msk.bf16.mxu1 %vm2631_vm0, %v2630_v0  ;;  %v2637_v40 = vmov 0  }
 0x834   :  { %2408 = vmatprep.subr.bf16.mxu1 %v2630_v0  ;;  %2438 = vset.pattern.permute.xlu0 %v2637_v40 }
 0x83a   :  { %2399 = vmatmul.mubr.msk.bf16.vlgmr.msra.gmra.mrb[48].mxu1 %vm105_vm2, %v1807_v19 }
 0x83b   :  { %2412 = vmatprep.mubr.msk.bf16.mxu1 %vm2631_vm0, %v2630_v0  ;;  %2409 = vmatpush3.bf16.msra.mxu1 %v2470_v23  ;;  %v2638_v23 = vmov 1  }
 0x83c   :  { %2410 = vmatprep.subr.bf16.mxu1 %v2630_v0  ;;  %v3128_v0 = vadd.f32 %v3089_v13, %v3061_v54  ;;  %2439 = vset.pattern.permute.xlu1 %v2638_v23 }
 0x83f   :  { %2411 = vmatpush3.bf16.msra.mxu1 %v2471_v41 }
 0x894   :  { %v1389_v42 = vpop.permute.xlu0 %1388 }
 0x895   :  { %v1391_v49 = vmax.f32 %v3092_v20, %v1389_v42 }
 0x898   :  { %v1393_v48 = vpop.permute.xlu0 %1392 }
 0x899   :  { %v3133_v32 = vmax.f32 %v1391_v49, %v1393_v48 }
 0x905   :  { %v1676_v45 = vpop.f32.mrb[44].mxu1 }
 0x906   :  { %v3120_v46 = vadd.f32 %v3089_v13, %v1676_v45  ;;  %v2388_v7 = vpop.f32.mrb[45].mxu1 }
 0x907   :  { %v1679_v18 = vpop.f32.mrb[46].mxu1 }
 0x908   :  { %1687 = vrot.lane.b32.xlu0 %v3120_v46, %s2636_s16  ;;  %1683 = vrot.lane.b32.xlu1 %v3120_v46, %s2635_s14  ;;  %v2389_v47 = vpop.f32.mrb[47].mxu1 }
 0x909   :  { %v1396_v47 = vsub.f32 %v3092_v20, %v3133_v32 }
 0x90c   :  { %1099 = vrot.lane.b32.xlu0 %v3128_v0, %s2635_s14 }
 0x90d   :  { %v1848_v50 = vpop.f32.mrb[48].mxu1 }
 0x90e   :  { %v1849_v52 = vadd.f32 %v1848_v50, %v3023_v28  ;;  %v2400_v53 = vpop.f32.mrb[49].mxu1 }
 0x90f   :  { %v1851_v55 = vpop.f32.mrb[50].mxu1 }
 0x910   :  { %v1902_v56 = vadd.f32 %v3025_v33, %v1849_v52  ;;  %1400 = vrot.lane.b32.xlu0 %v3133_v32, %s2628_s13  ;;  %v2401_v54 = vpop.f32.mrb[51].mxu1 }
 0x912   :  { %v1910_v57 = vadd.f32 %v3039_v43, %v1902_v56  ;;  %v1397_v56 = vmul.f32 1.442695, %v1396_v47 }
 0x914   :  { %v1911_v58 = vmax.f32 %v1910_v57, 0.0  ;;  %1406 = vrot.lane.b32.xlu0 %v3133_v32, %s2624_s28 }
 0x916   :  { %v1912_v59 = vpack.c.bf16 %v1911_v58, %v1911_v58 }
 0x918   :  { %2413 = vmatmul.mubr.msk.bf16.vlgmr.msra.gmra.mrb[52].mxu1 %vm180_vm3, %v1912_v59 }
 0x97a   :  { %v1684_v60 = vpop.permute.xlu1 %1683  ;;  %v1688_v61 = vpop.permute.xlu0 %1687 }
 0x97b   :  { %v1686_v28 = vmax.f32 %v3120_v46, %v1684_v60 }
 0x97d   :  { %v3144_v63 = vmax.f32 %v1686_v28, %v1688_v61 }
 0x97e   :  { %v1100_v6 = vpop.permute.xlu0 %1099 }
 0x97f   :  { %1701 = vrot.lane.b32.xlu0 %v3144_v63, %s2624_s28  ;;  %v1102_v29 = vmax.f32 %v3128_v0, %v1100_v6 }
 0x982   :  { %v1401_v8 = vpop.permute.xlu0 %1400 }
 0x983   :  { %v1403_v9 = vsub.f32 %v3092_v20, %v1401_v8 }
 0x985   :  { %v1404_v10 = vmul.f32 1.442695, %v1403_v9  ;;  %v2639_v9 = vmov 2  }
 0x986   :  { %v1407_v3 = vpop.permute.xlu0 %1406 }
 0x987   :  { %v1409_v12 = vsub.f32 %v3092_v20, %v1407_v3  ;;  %2472 = vpow2.f32 %v1404_v10  ;;  %v1691_v20 = vsub.f32 %v3120_v46, %v3144_v63 }
 0x989   :  { %v1410_v11 = vmul.f32 1.442695, %v1409_v12  ;;  %v1692_v60 = vmul.f32 1.442695, %v1691_v20 }
 0x98b   :  { %2474 = vpow2.f32 %v1410_v11 }
 0x991   :  { %v2473_v37 = vpop.eup %2472 }
 0x995   :  { %v2475_v19 = vpop.eup %2474 }
 0x9eb   :  { %v1973_v33 = vpop.f32.mrb[52].mxu1 }
 0x9ec   :  { %v3149_v1 = vadd.f32 %v3089_v13, %v1973_v33  ;;  %v2414_v43 = vpop.f32.mrb[53].mxu1 }
 0x9ed   :  { %v1976_v4 = vpop.f32.mrb[54].mxu1 }
 0x9ee   :  { %1980 = vrot.lane.b32.xlu1 %v3149_v1, %s2635_s14  ;;  %v2415_v5 = vpop.f32.mrb[55].mxu1 }
 0x9f1   :  { %v1702_v14 = vpop.permute.xlu0 %1701 }
 0x9f2   :  { %1984 = vrot.lane.b32.xlu1 %v3149_v1, %s2636_s16  ;;  %v1704_v25 = vsub.f32 %v3120_v46, %v1702_v14 }
 0x9f4   :  { %v1705_v30 = vmul.f32 1.442695, %v1704_v25 }
 0x9f6   :  { %1103 = vrot.lane.b32.xlu1 %v3128_v0, %s2636_s16  ;;  %2476 = vpow2.f32 %v1705_v30 }
 0x9fa   :  { %1695 = vrot.lane.b32.xlu1 %v3144_v63, %s2628_s13 }
 0xa00   :  { %v3177_v41 = vpop.eup %2476 }
 0xa60   :  { %v1981_v13 = vpop.permute.xlu1 %1980 }
 0xa61   :  { %v1983_v21 = vmax.f32 %v3149_v1, %v1981_v13 }
 0xa64   :  { %v1985_v26 = vpop.permute.xlu1 %1984 }
 0xa65   :  { %v1987_v27 = vmax.f32 %v1983_v21, %v1985_v26 }
 0xa67   :  { %1992 = vrot.lane.b32.xlu1 %v1987_v27, %s2628_s13  ;;  %v1988_v43 = vsub.f32 %v3149_v1, %v1987_v27 }
 0xa68   :  { %v1104_v31 = vpop.permute.xlu1 %1103 }
 0xa69   :  { %v3165_v34 = vmax.f32 %v1102_v29, %v1104_v31 }
 0xa6b   :  { %1998 = vrot.lane.b32.xlu1 %v1987_v27, %s2624_s28  ;;  %1111 = vrot.lane.b32.xlu0 %v3165_v34, %s2628_s13  ;;  %v1107_v13 = vsub.f32 %v3128_v0, %v3165_v34  ;;  %s2642_s13 = smov 12  }
 0xa6c   :  { %v1696_v35 = vpop.permute.xlu1 %1695 }
 0xa6d   :  { %v1698_v36 = vsub.f32 %v3120_v46, %v1696_v35  ;;  %v1989_v46 = vmul.f32 1.442695, %v1988_v43  ;;  %v1108_v21 = vmul.f32 1.442695, %v1107_v13 }
 0xa6f   :  { %v1699_v38 = vmul.f32 1.442695, %v1698_v36  ;;  %1117 = vrot.lane.b32.xlu1 %v3165_v34, %s2624_s28  ;;  %1413 = vrot.lane.b32.xlu0 %v2473_v37, %s2635_s14  ;;  %s2641_s28 = smov 8  }
 0xa71   :  { %2478 = vpow2.f32 %v1699_v38 }
 0xa73   :  { %1418 = vrot.lane.b32.xlu0 %v2475_v19, %s2636_s16 }
 0xa77   :  { %1713 = vrot.lane.b32.xlu0 %v3177_v41, %s2636_s16 }
 0xa7b   :  { %v2479_v42 = vpop.eup %2478 }
 0xa7c   :  { %1708 = vrot.lane.b32.xlu1 %v2479_v42, %s2635_s14 }
 0xad9   :  { %v1993_v45 = vpop.permute.xlu1 %1992 }
 0xada   :  { %v1995_v7 = vsub.f32 %v3149_v1, %v1993_v45 }
 0xadc   :  { %v1996_v18 = vmul.f32 1.442695, %v1995_v7  ;;  %v1429_v7 = vrot.slane %v3008_v62, 4 }
 0xadd   :  { %v1112_v48 = vpop.permute.xlu0 %1111  ;;  %v1999_v49 = vpop.permute.xlu1 %1998 }
 0xade   :  { %2480 = vpow2.f32 %v1996_v18  ;;  %v1114_v50 = vsub.f32 %v3128_v0, %v1112_v48  ;;  %v2001_v52 = vsub.f32 %v3149_v1, %v1999_v49 }
 0xae0   :  { %v1115_v53 = vmul.f32 1.442695, %v1114_v50  ;;  %v2002_v55 = vmul.f32 1.442695, %v2001_v52 }
 0xae1   :  { %v1118_v54 = vpop.permute.xlu1 %1117  ;;  %v1414_v63 = vpop.permute.xlu0 %1413 }
 0xae2   :  { %2482 = vpow2.f32 %v1115_v53  ;;  %v1120_v57 = vsub.f32 %v3128_v0, %v1118_v54 }
 0xae3   :  { %2484 = vpow2.f32 %v2002_v55 }
 0xae4   :  { %v1121_v58 = vmul.f32 1.442695, %v1120_v57  ;;  %2486 = vpow2.f32 %v1397_v56 }
 0xae5   :  { %v1419_v5 = vpop.permute.xlu0 %1418 }
 0xae6   :  { %2488 = vpow2.f32 %v1121_v58 }
 0xae7   :  { %2490 = vpow2.f32 %v1692_v60 }
 0xae8   :  { %v2481_v59 = vpop.eup %2480  ;;  %2492 = vpow2.f32 %v1989_v46 }
 0xae9   :  { %2005 = vrot.lane.b32.xlu1 %v2481_v59, %s2635_s14  ;;  %v1714_v10 = vpop.permute.xlu0 %1713 }
 0xaec   :  { %v2483_v32 = vpop.eup %2482 }
 0xaed   :  { %v2485_v28 = vpop.eup %2484  ;;  %1124 = vrot.lane.b32.xlu0 %v2483_v32, %s2635_s14 }
 0xaee   :  { %2010 = vrot.lane.b32.xlu1 %v2485_v28, %s2636_s16  ;;  %v2487_v61 = vpop.eup %2486  ;;  %v1709_v6 = vpop.permute.xlu1 %1708 }
 0xaef   :  { %v1416_v8 = vadd.f32 %v2487_v61, %v1414_v63 }
 0xaf0   :  { %v2489_v33 = vpop.eup %2488 }
 0xaf1   :  { %1425 = vperm.xlu0 %2438, %v2487_v61   ;;  %v2491_v4 = vpop.eup %2490  ;;  %v1421_v1 = vadd.f32 %v1419_v5, %v1416_v8 }
 0xaf2   :  { %1129 = vrot.lane.b32.xlu1 %v2489_v33, %s2636_s16  ;;  %v1711_v3 = vadd.f32 %v2491_v4, %v1709_v6  ;;  %v2493_v12 = vpop.eup %2492 }
 0xaf3   :  { %2494 = vrcp.f32 %v1421_v1 }
 0xaf4   :  { %v1716_v14 = vadd.f32 %v1714_v10, %v1711_v3 }
 0xaf5   :  { %2441 = vset.pattern.permute.xlu0 %v2638_v23 }
 0xaf6   :  { %1433 = vperm.xlu1 %2439, %v2473_v37   ;;  %1725 = vperm.xlu0 %2441, %v2479_v42   ;;  %2496 = vrcp.f32 %v1716_v14 }
 0xaf7   :  { %2498 = vpow2.f32 %v1108_v21 }
 0xafa   :  { %2440 = vset.pattern.permute.xlu1 %v2637_v40  ;;  %2025 = vperm.xlu0 %2441, %v2481_v59  }
 0xafb   :  { %1720 = vperm.xlu1 %2440, %v2491_v4  }
 0xafd   :  { %v2495_v11 = vpop.eup %2494 }
 0xafe   :  { %2446 = vset.pattern.permute.xlu0 %v2639_v9 }
 0xaff   :  { %2442 = vset.pattern.permute.xlu1 %v2639_v9  ;;  %2031 = vperm.xlu0 %2446, %v2485_v28  }
 0xb00   :  { %1439 = vperm.xlu1 %2442, %v2475_v19   ;;  %v2497_v25 = vpop.eup %2496 }
 0xb01   :  { %v2499_v26 = vpop.eup %2498 }
 0xb03   :  { %2447 = vset.pattern.permute.xlu0 %v2637_v40 }
 0xb04   :  { %2443 = vset.pattern.permute.xlu1 %v2637_v40 }
 0xb05   :  { %2017 = vperm.xlu1 %2443, %v2493_v12  }
 0xb09   :  { %2444 = vset.pattern.permute.xlu1 %v2639_v9 }
 0xb0a   :  { %1731 = vperm.xlu1 %2444, %v3177_v41  }
 0xb0e   :  { %2445 = vset.pattern.permute.xlu1 %v2637_v40 }
 0xb0f   :  { %1446 = vperm.xlu1 %2445, %v2495_v11  }
 0xb13   :  { %1738 = vperm.xlu1 %2445, %v2497_v25  }
 0xb17   :  { %1136 = vperm.xlu1 %2445, %v2499_v26  }
 0xb1b   :  { %2448 = vset.pattern.permute.xlu1 %v2638_v23 }
 0xb1c   :  { %1141 = vperm.xlu1 %2448, %v2483_v32   ;;  %v2021_v32 = vrot.slane %v3014_v2, 4 }
 0xb20   :  { %2450 = vset.pattern.permute.xlu1 %v2637_v40 }
 0xb5b   :  { %v2006_v0 = vpop.permute.xlu1 %2005 }
 0xb5c   :  { %v2008_v27 = vadd.f32 %v2493_v12, %v2006_v0 }
 0xb5f   :  { %v1125_v29 = vpop.permute.xlu0 %1124 }
 0xb60   :  { %v2011_v30 = vpop.permute.xlu1 %2010  ;;  %v1127_v34 = vadd.f32 %v2499_v26, %v1125_v29 }
 0xb61   :  { %v2013_v31 = vadd.f32 %v2011_v30, %v2008_v27 }
 0xb63   :  { %2500 = vrcp.f32 %v2013_v31 }
 0xb64   :  { %v1130_v35 = vpop.permute.xlu1 %1129 }
 0xb65   :  { %v1132_v36 = vadd.f32 %v1130_v35, %v1127_v34 }
 0xb67   :  { %2502 = vrcp.f32 %v1132_v36 }
 0xb6d   :  { %v2501_v37 = vpop.eup %2500 }
 0xb6e   :  { %2038 = vperm.xlu0 %2447, %v2501_v37  }
 0xb70   :  { %v1426_v42 = vpop.permute.xlu0 %1425 }
 0xb71   :  { %v2503_v38 = vpop.eup %2502  ;;  %v1431_v47 = vmul.f32 %v1429_v7, %v1426_v42 }
 0xb72   :  { %2449 = vset.pattern.permute.xlu0 %v2639_v9  ;;  %1154 = vperm.xlu1 %2450, %v2503_v38  }
 0xb73   :  { %1147 = vperm.xlu0 %2449, %v2489_v33  }
 0xb75   :  { %v1434_v19 = vpop.permute.xlu1 %1433  ;;  %v1726_v50 = vpop.permute.xlu0 %1725 }
 0xb76   :  { %v1436_v18 = vmul.f32 %v1434_v19, %v2860_v22  ;;  %v1728_v55 = vmul.f32 %v1726_v50, %v2965_v44 }
 0xb77   :  { %2451 = vset.pattern.permute.xlu0 %v2637_v40 }
 0xb78   :  { %v1437_v52 = vadd.f32 %v1436_v18, %v1431_v47 }
 0xb7a   :  { %v1721_v23 = vpop.permute.xlu1 %1720 }
 0xb7b   :  { %v1723_v53 = vmul.f32 %v1721_v23, %v3014_v2 }
 0xb7d   :  { %v1729_v57 = vadd.f32 %v1728_v55, %v1723_v53 }
 0xb7f   :  { %v1440_v41 = vpop.permute.xlu1 %1439 }
 0xb80   :  { %v1442_v48 = vmul.f32 %v1440_v41, %v2951_v39  ;;  %v2026_v39 = vpop.permute.xlu0 %2025 }
 0xb81   :  { %v2028_v28 = vmul.f32 %v2026_v39, %v2863_v24 }
 0xb82   :  { %v1443_v56 = vadd.f32 %v1442_v48, %v1437_v52 }
 0xb84   :  { %v2018_v45 = vpop.permute.xlu1 %2017  ;;  %v2032_v61 = vpop.permute.xlu0 %2031 }
 0xb85   :  { %v2023_v60 = vmul.f32 %v2021_v32, %v2018_v45  ;;  %v2034_v33 = vmul.f32 %v2032_v61, %v2928_v17 }
 0xb89   :  { %v1732_v49 = vpop.permute.xlu1 %1731 }
 0xb8a   :  { %v1734_v40 = vmul.f32 %v1732_v49, %v2926_v16  ;;  %v2029_v16 = vadd.f32 %v2028_v28, %v2023_v60 }
 0xb8c   :  { %v1735_v59 = vadd.f32 %v1734_v40, %v1729_v57  ;;  %v2035_v46 = vadd.f32 %v2034_v33, %v2029_v16 }
 0xb8e   :  { %v1447_v54 = vpop.permute.xlu1 %1446 }
 0xb8f   :  { %v1449_v58 = vmul.f32 %v1447_v54, %v1443_v56 }
 0xb91   :  { %1451 = vrot.lane.b32.xlu1 %v1449_v58, %s2640_s9 }
 0xb92   :  { %v1739_v22 = vpop.permute.xlu1 %1738 }
 0xb93   :  { %v1741_v20 = vmul.f32 %v1739_v22, %v1735_v59 }
 0xb95   :  { %1743 = vrot.lane.b32.xlu0 %v1741_v20, %s2641_s28 }
 0xb96   :  { %v1137_v44 = vpop.permute.xlu1 %1136 }
 0xb97   :  { %v1139_v6 = vmul.f32 %v1137_v44, %v3008_v62 }
 0xb9b   :  { %v1142_v43 = vpop.permute.xlu1 %1141 }
 0xb9c   :  { %v1144_v5 = vmul.f32 %v1142_v43, %v2891_v51 }
 0xb9e   :  { %v1145_v2 = vadd.f32 %v1144_v5, %v1139_v6 }
 0xbed   :  { %v2039_v63 = vpop.permute.xlu0 %2038 }
 0xbee   :  { %v2041_v4 = vmul.f32 %v2039_v63, %v2035_v46 }
 0xbf0   :  { %2043 = vrot.lane.b32.xlu1 %v2041_v4, %s2642_s13 }
 0xbf1   :  { %v1155_v1 = vpop.permute.xlu1 %1154 }
 0xbf2   :  { %v1148_v8 = vpop.permute.xlu0 %1147 }
 0xbf3   :  { %v1150_v9 = vmul.f32 %v1148_v8, %v2924_v15 }
 0xbf5   :  { %v1151_v24 = vadd.f32 %v1150_v9, %v1145_v2 }
 0xbf7   :  { %v1157_v3 = vmul.f32 %v1155_v1, %v1151_v24 }
 0xbf9   :  { %1159 = vst.msk [vmem:[#allocation10] sm:$0xf] %vm1158_vm9, %v1157_v3 }
 0xc03   :  { %v1452_v17 = vpop.permute.xlu1 %1451 }
 0xc04   :  { %1455 = vst.msk [vmem:[#allocation10] sm:$0xf] %vm1454_vm10, %v1452_v17 }
 0xc07   :  { %v1744_v10 = vpop.permute.xlu0 %1743 }
 0xc08   :  { %1747 = vst.msk [vmem:[#allocation10] sm:$0xf] %vm1746_vm11, %v1744_v10 }
 0xc62   :  { %v2044_v51 = vpop.permute.xlu1 %2043 }
 0xc63   :  { %2047 = vst.msk [vmem:[#allocation10] sm:$0xf] %vm2046_vm12, %v2044_v51 }
 0xc64   :  { %2603 = shalt.err (!%p2600_p8)
}
 0xc65   :  { %s2604_s1 = scalar_lea.hbm %s3241_s11, 64 }
 0xc66   :  { %p2605_p9 = scmp.ne.s32.totalorder %s3241_s11, %s2604_s1  ;;  %p2608_p10 = scmp.lt.u32.totalorder %s2604_s1, %s3241_s11 }
 0xc68   :  { %p2610_p11 = pnand %p2608_p10, %p2605_p9 }
 0xc6a   :  { %2613 = shalt.err (!%p2610_p11)
}
 0xc6b   :  { %2057 = dma.vmem_to_hbm [thread:$0]  %s2055_s20, 64, %s3241_s11, [#allocation4]  }
 0xc6c   :  { %2620 = dma.done.wait [#allocation4], 64  }
 0xc6d   :  { %2621 = vsyncadd [#allocation4], 4294967232 }
 0xc6e   :  { %2061 = vsyncpa [#allocation3], 1 }
 0xc6f   :  { %2062 = vsyncpa [#allocation6], 1 }
 0xc70   :  { %2063 = vsyncpa [#allocation9], 1 }
 0xc71   :  { %2064 = vsyncpa [#allocation4], 1 }

</bundles_post_ra>
